<compile_context>
chip_gen: v7x
topology: tpu7x:2x2x1
jax: 0.10.0
libtpu: 0.0.40
codegen_flags: <defaults>
</compile_context>

<pallas_src>
import functools

import jax
import jax.numpy as jnp
import numpy as np
from jax.experimental import pallas as pl
from jax.experimental.pallas import tpu as pltpu


# ------------------------------ fused kernel --------------------------------

def _make_fused_kernel(B, L, D, hidden_size, window, stride):
    H0, H1, H2 = hidden_size
    W0, W1, W2 = window
    S0, S1, S2 = stride

    # Encoder lengths.
    L1 = (L - W0) // S0 + 1
    L2 = (L1 - W1) // S1 + 1
    L3 = (L2 - W2) // S2 + 1
    assert L3 == 1, "encoder fclayer must reduce length to 1 (PyTorch squeeze)"
    # Decoder lengths.
    Lg1 = W2                          # (1 - 1) * S2 + W2
    Lg2 = (Lg1 - 1) * S1 + W1
    Lg3 = (Lg2 - 1) * S0 + W0

    def _rows(start, n, s):
        # Window of n rows starting at `start` with stride s (all static).
        return pl.ds(start, n) if s == 1 else pl.ds(start, n, stride=s)

    def conv_layer(in_ref, w_ref, b_ref, out_ref, Lin, Lo, Cin, KW, S):
        """Full-width Conv2d == per-tap strided-window matmuls accumulated over taps.
        in_ref : (B*Lin, Cin)   w_ref : (KW*Cin, Cout)   b_ref : (1, Cout)
        out_ref: (B*Lo, Cout)."""
        b_row = b_ref[...]                                      # (1, Cout), hoisted
        for b in range(B):
            acc = None
            for wi in range(KW):
                lhs = in_ref[_rows(b * Lin + wi, Lo, S), :]     # (Lo, Cin)
                w_tap = w_ref[pl.ds(wi * Cin, Cin), :]          # (Cin, Cout)
                part = jnp.dot(lhs, w_tap, preferred_element_type=jnp.float32)
                acc = part if acc is None else acc + part
            out_ref[pl.ds(b * Lo, Lo), :] = acc + b_row         # one slab store / batch

    def overlap_add(prod, out_ref, T, KW, Dout, S, Lout):
        """Scatter the (B*T, KW*Dout) matmul product of a ConvTranspose2d into
        (B*Lout, Dout) rows.  No bias here — the consumer adds it once."""
        for b in range(B):
            for y in range(Lout):
                pieces = []
                for t in range(T):
                    wi = y - t * S
                    if 0 <= wi < KW:
                        pieces.append(prod[b * T + t:b * T + t + 1,
                                           wi * Dout:(wi + 1) * Dout])
                if pieces:
                    row = pieces[0]
                    for p in pieces[1:]:
                        row = row + p
                else:
                    row = jnp.zeros((1, Dout), jnp.float32)
                out_ref[pl.ds(b * Lout + y, 1), :] = row

    def kernel(x_ref, we1_ref, be1_ref, we2_ref, be2_ref, wefc_ref, befc_ref,
               wdfc_ref, wd2_ref, wd1_ref, bdec_ref,
               o_ref, h1_ref, h2_ref, hid_ref, g1_ref, g2_ref):
        # ------------------------------ encoder ------------------------------
        conv_layer(x_ref,  we1_ref,  be1_ref,  h1_ref,  L,  L1, D,  W0, S0)
        conv_layer(h1_ref, we2_ref,  be2_ref,  h2_ref,  L1, L2, H0, W1, S1)
        conv_layer(h2_ref, wefc_ref, befc_ref, hid_ref, L2, 1,  H1, W2, S2)
        # ------------------------------ decoder ------------------------------
        # de_fclayer: one matmul over the whole batch.
        prod = jnp.dot(hid_ref[...], wdfc_ref[...],
                       preferred_element_type=jnp.float32)       # (B, W2*H1)
        overlap_add(prod, g1_ref, 1, W2, H1, S2, Lg1)
        # de_layer2: previous bias hoisted into a single full-block add.
        lhs = g1_ref[...] + bdec_ref[0]                           # (B*Lg1, H1)
        prod = jnp.dot(lhs, wd2_ref[...],
                       preferred_element_type=jnp.float32)        # (B*Lg1, W1*H0)
        overlap_add(prod, g2_ref, Lg1, W1, H0, S1, Lg2)
        # de_layer1: writes straight into the output slab.
        lhs = g2_ref[...] + bdec_ref[1]                           # (B*Lg2, H0)
        prod = jnp.dot(lhs, wd1_ref[...],
                       preferred_element_type=jnp.float32)        # (B*Lg2, W0*D)
        overlap_add(prod, o_ref, Lg2, W0, D, S0, Lg3)
        o_ref[...] = o_ref[...] + bdec_ref[2]                     # final bias, one RMW

    return kernel, (L1, L2, Lg1, Lg2, Lg3)


def autoencoder_forward(x, p, input_size, hidden_size, window, stride):
    """x: (B, L, D) -> (B, Lout, D), matching DeconvolutionAutoEncoer.forward."""
    B, L, D = x.shape
    H0, H1, H2 = hidden_size
    W0, W1, W2 = window
    kernel, (L1, L2, Lg1, Lg2, Lg3) = _make_fused_kernel(
        B, L, D, hidden_size, window, stride)

    f32 = jnp.float32

    def enc_w(w):   # Conv2d weight (O, 1, KW, C) -> per-tap stacked (KW*C, O)
        O, _, KW, C = w.shape
        return jnp.transpose(w[:, 0], (1, 2, 0)).reshape(KW * C, O).astype(f32)

    args = (
        x.reshape(B * L, D).astype(f32),
        enc_w(p["w_e1"]),  p["b_e1"].reshape(1, H0).astype(f32),
        enc_w(p["w_e2"]),  p["b_e2"].reshape(1, H1).astype(f32),
        enc_w(p["w_efc"]), p["b_efc"].reshape(1, H2).astype(f32),
        p["w_dfc"].reshape(H2, W2 * H1).astype(f32),
        p["w_d2"].reshape(H1, W1 * H0).astype(f32),
        p["w_d1"].reshape(H0, W0 * D).astype(f32),
        jnp.concatenate([p["b_dfc"], p["b_d2"], p["b_d1"]]).astype(f32),
    )
    vmem = lambda: pl.BlockSpec(memory_space=pltpu.MemorySpace.VMEM)
    smem = pl.BlockSpec(memory_space=pltpu.MemorySpace.SMEM)

    out2d = pl.pallas_call(
        kernel,
        out_shape=jax.ShapeDtypeStruct((B * Lg3, D), f32),
        in_specs=[vmem() for _ in range(10)] + [smem],
        out_specs=vmem(),
        scratch_shapes=[
            pltpu.VMEM((B * L1, H0), f32),    # h1 (encoder layer 1)
            pltpu.VMEM((B * L2, H1), f32),    # h2 (encoder layer 2)
            pltpu.VMEM((B, H2), f32),         # hidden code
            pltpu.VMEM((B * Lg1, H1), f32),   # g1 (decoder fc)
            pltpu.VMEM((B * Lg2, H0), f32),   # g2 (decoder layer 2)
        ],
    )(*args)
    return out2d.reshape(B, Lg3, D)


# ------------------------------ parameters ----------------------------------

def init_params(key, input_size, hidden_size, window_size):
    """Deterministic PyTorch-shaped parameters (Conv2d: (O,1,kH,kW), ConvT2d: (I,1,kH,kW))."""
    H0, H1, H2 = hidden_size
    W0, W1, W2 = window_size
    D = input_size

    def unif(k, shape, fan_in):
        bound = 1.0 / np.sqrt(fan_in)
        return jax.random.uniform(k, shape, jnp.float32, -bound, bound)

    ks = jax.random.split(key, 12)
    return dict(
        # Encoder (nn.Conv2d): weight (out_ch, in_ch=1, kH, kW)
        w_e1=unif(ks[0], (H0, 1, W0, D), W0 * D),    b_e1=unif(ks[1], (H0,), W0 * D),
        w_e2=unif(ks[2], (H1, 1, W1, H0), W1 * H0),  b_e2=unif(ks[3], (H1,), W1 * H0),
        w_efc=unif(ks[4], (H2, 1, W2, H1), W2 * H1), b_efc=unif(ks[5], (H2,), W2 * H1),
        # Decoder (nn.ConvTranspose2d): weight (in_ch, out_ch=1, kH, kW)
        w_dfc=unif(ks[6], (H2, 1, W2, H1), W2 * H1), b_dfc=unif(ks[7], (1,), W2 * H1),
        w_d2=unif(ks[8], (H1, 1, W1, H0), W1 * H0),  b_d2=unif(ks[9], (1,), W1 * H0),
        w_d1=unif(ks[10], (H0, 1, W0, D), W0 * D),   b_d1=unif(ks[11], (1,), W0 * D),
    )


# ---------------------- pure-XLA reference (for checking) -------------------

def _conv2d_ref(x, w, b, s):
    y = jax.lax.conv_general_dilated(x, w, (s, s), 'VALID',
                                     dimension_numbers=('NCHW', 'OIHW', 'NCHW'))
    return y + b[None, :, None, None]


def _convT2d_ref(x, w, b, s):
    # PyTorch ConvTranspose2d(padding=0) == adjoint of VALID Conv2d.
    N, Cin, Hp, Wp = x.shape
    _, Cout, kH, kW = w.shape
    H = (Hp - 1) * s + kH
    Wo = (Wp - 1) * s + kW

    def fwd(z):
        return jax.lax.conv_general_dilated(z, w, (s, s), 'VALID',
                                            dimension_numbers=('NCHW', 'OIHW', 'NCHW'))

    _, vjp_fn = jax.vjp(fwd, jnp.zeros((N, Cout, H, Wo), x.dtype))
    (y,) = vjp_fn(x)
    return y + b[None, :, None, None]


def reference_forward(x, p, stride):
    s0, s1, s2 = stride
    x4 = x[:, None, :, :]
    h1 = _conv2d_ref(x4, p["w_e1"], p["b_e1"], s0)
    h2 = _conv2d_ref(jnp.transpose(h1, (0, 3, 2, 1)), p["w_e2"], p["b_e2"], s1)
    h3 = _conv2d_ref(jnp.transpose(h2, (0, 3, 2, 1)), p["w_efc"], p["b_efc"], s2)
    hidden = h3[:, :, 0, 0]
    z = hidden[:, :, None, None]
    g1 = _convT2d_ref(z, p["w_dfc"], p["b_dfc"], s2)
    g2 = _convT2d_ref(jnp.transpose(g1, (0, 3, 2, 1)), p["w_d2"], p["b_d2"], s1)
    g3 = _convT2d_ref(jnp.transpose(g2, (0, 3, 2, 1)), p["w_d1"], p["b_d1"], s0)
    return g3[:, 0, :, :]


# ----------------------------------- main -----------------------------------

if __name__ == "__main__":
    # Small config consistent with the module (original: 300/(300,600,500)/(5,5,12)/(2,2,1)).
    input_size = 16
    hidden_size = (8, 12, 16)
    window_size = (3, 3, 4)
    stride_size = (2, 2, 1)
    B = 2
    # Sequence length chosen so the encoder fclayer reduces the length to 1,
    # which the PyTorch module implicitly requires for its squeeze() calls.
    L2 = window_size[2]
    L1 = (L2 - 1) * stride_size[1] + window_size[1]
    L = (L1 - 1) * stride_size[0] + window_size[0]      # = 19

    key = jax.random.PRNGKey(0)
    kx, kp = jax.random.split(key)
    x = jax.random.normal(kx, (B, L, input_size), jnp.float32)   # (batch, len, dim)
    params = init_params(kp, input_size, hidden_size, window_size)

    fwd = jax.jit(functools.partial(
        autoencoder_forward, input_size=input_size, hidden_size=hidden_size,
        window=window_size, stride=stride_size))

    out = jax.block_until_ready(fwd(x, params))
    assert out.shape == (B, L, input_size), out.shape

    ref = jax.block_until_ready(reference_forward(x, params, stride_size))
    np.testing.assert_allclose(np.asarray(out), np.asarray(ref), rtol=1e-4, atol=1e-4)

    print("KERNEL_OK")
</pallas_src>

<mosaic_0001>
module attributes {stable_mosaic.version = 11 : i64} {
  func.func @kernel(%arg0: memref<38x16xf32, #tpu.memory_space<vmem>>, %arg1: memref<48x8xf32, #tpu.memory_space<vmem>>, %arg2: memref<1x8xf32, #tpu.memory_space<vmem>>, %arg3: memref<24x12xf32, #tpu.memory_space<vmem>>, %arg4: memref<1x12xf32, #tpu.memory_space<vmem>>, %arg5: memref<48x16xf32, #tpu.memory_space<vmem>>, %arg6: memref<1x16xf32, #tpu.memory_space<vmem>>, %arg7: memref<16x48xf32, #tpu.memory_space<vmem>>, %arg8: memref<12x24xf32, #tpu.memory_space<vmem>>, %arg9: memref<8x48xf32, #tpu.memory_space<vmem>>, %arg10: memref<3xf32, #tpu.memory_space<smem>>, %arg11: memref<38x16xf32, #tpu.memory_space<vmem>>, %arg12: memref<18x8xf32, #tpu.memory_space<vmem>>, %arg13: memref<8x12xf32, #tpu.memory_space<vmem>>, %arg14: memref<2x16xf32, #tpu.memory_space<vmem>>, %arg15: memref<8x12xf32, #tpu.memory_space<vmem>>, %arg16: memref<18x8xf32, #tpu.memory_space<vmem>>) attributes {dimension_semantics = [], scalar_prefetch = 0 : i64, scratch_operands = 5 : i64, tpu.core_type = #tpu.core_type<tc>} {
    %c0 = arith.constant 0 : index
    %c0_0 = arith.constant 0 : index
    %0 = vector.load %arg2[%c0, %c0_0] : memref<1x8xf32, #tpu.memory_space<vmem>>, vector<1x8xf32>
    %c0_1 = arith.constant 0 : index
    %c0_2 = arith.constant 0 : index
    %1 = tpu.strided_load %arg0[%c0_1, %c0_2] {strides = array<i32: 2, 1>} : memref<38x16xf32, #tpu.memory_space<vmem>>, vector<9x16xf32>
    %c0_3 = arith.constant 0 : index
    %c0_4 = arith.constant 0 : index
    %2 = vector.load %arg1[%c0_3, %c0_4] : memref<48x8xf32, #tpu.memory_space<vmem>>, vector<16x8xf32>
    %cst = arith.constant dense<0.000000e+00> : vector<9x8xf32>
    %3 = tpu.matmul %1, %2, %cst {dimension_numbers = #tpu.dot_dimension_numbers<[1], [0], [0], [1], [0, 0, 1, 1], [], []>} : vector<9x16xf32>, vector<16x8xf32>, vector<9x8xf32> -> vector<9x8xf32>
    %c1 = arith.constant 1 : index
    %c0_5 = arith.constant 0 : index
    %4 = tpu.strided_load %arg0[%c1, %c0_5] {strides = array<i32: 2, 1>} : memref<38x16xf32, #tpu.memory_space<vmem>>, vector<9x16xf32>
    %c16 = arith.constant 16 : index
    %c0_6 = arith.constant 0 : index
    %5 = vector.load %arg1[%c16, %c0_6] : memref<48x8xf32, #tpu.memory_space<vmem>>, vector<16x8xf32>
    %cst_7 = arith.constant dense<0.000000e+00> : vector<9x8xf32>
    %6 = tpu.matmul %4, %5, %cst_7 {dimension_numbers = #tpu.dot_dimension_numbers<[1], [0], [0], [1], [0, 0, 1, 1], [], []>} : vector<9x16xf32>, vector<16x8xf32>, vector<9x8xf32> -> vector<9x8xf32>
    %7 = arith.addf %3, %6 : vector<9x8xf32>
    %c2 = arith.constant 2 : index
    %c0_8 = arith.constant 0 : index
    %8 = tpu.strided_load %arg0[%c2, %c0_8] {strides = array<i32: 2, 1>} : memref<38x16xf32, #tpu.memory_space<vmem>>, vector<9x16xf32>
    %c32 = arith.constant 32 : index
    %c0_9 = arith.constant 0 : index
    %9 = vector.load %arg1[%c32, %c0_9] : memref<48x8xf32, #tpu.memory_space<vmem>>, vector<16x8xf32>
    %cst_10 = arith.constant dense<0.000000e+00> : vector<9x8xf32>
    %10 = tpu.matmul %8, %9, %cst_10 {dimension_numbers = #tpu.dot_dimension_numbers<[1], [0], [0], [1], [0, 0, 1, 1], [], []>} : vector<9x16xf32>, vector<16x8xf32>, vector<9x8xf32> -> vector<9x8xf32>
    %11 = arith.addf %7, %10 : vector<9x8xf32>
    %12 = vector.broadcast %0 : vector<1x8xf32> to vector<9x8xf32>
    %13 = arith.addf %11, %12 : vector<9x8xf32>
    %c0_11 = arith.constant 0 : index
    %c0_12 = arith.constant 0 : index
    %14 = vector.load %arg12[%c0_11, %c0_12] : memref<18x8xf32, #tpu.memory_space<vmem>>, vector<9x8xf32>
    tpu.vector_store %arg12[%c0_11, %c0_12], %13 {strides = array<i32>} : memref<18x8xf32, #tpu.memory_space<vmem>>, vector<9x8xf32>,
    %c19 = arith.constant 19 : index
    %c0_13 = arith.constant 0 : index
    %15 = tpu.strided_load %arg0[%c19, %c0_13] {strides = array<i32: 2, 1>} : memref<38x16xf32, #tpu.memory_space<vmem>>, vector<9x16xf32>
    %c0_14 = arith.constant 0 : index
    %c0_15 = arith.constant 0 : index
    %16 = vector.load %arg1[%c0_14, %c0_15] : memref<48x8xf32, #tpu.memory_space<vmem>>, vector<16x8xf32>
    %cst_16 = arith.constant dense<0.000000e+00> : vector<9x8xf32>
    %17 = tpu.matmul %15, %16, %cst_16 {dimension_numbers = #tpu.dot_dimension_numbers<[1], [0], [0], [1], [0, 0, 1, 1], [], []>} : vector<9x16xf32>, vector<16x8xf32>, vector<9x8xf32> -> vector<9x8xf32>
    %c20 = arith.constant 20 : index
    %c0_17 = arith.constant 0 : index
    %18 = tpu.strided_load %arg0[%c20, %c0_17] {strides = array<i32: 2, 1>} : memref<38x16xf32, #tpu.memory_space<vmem>>, vector<9x16xf32>
    %c16_18 = arith.constant 16 : index
    %c0_19 = arith.constant 0 : index
    %19 = vector.load %arg1[%c16_18, %c0_19] : memref<48x8xf32, #tpu.memory_space<vmem>>, vector<16x8xf32>
    %cst_20 = arith.constant dense<0.000000e+00> : vector<9x8xf32>
    %20 = tpu.matmul %18, %19, %cst_20 {dimension_numbers = #tpu.dot_dimension_numbers<[1], [0], [0], [1], [0, 0, 1, 1], [], []>} : vector<9x16xf32>, vector<16x8xf32>, vector<9x8xf32> -> vector<9x8xf32>
    %21 = arith.addf %17, %20 : vector<9x8xf32>
    %c21 = arith.constant 21 : index
    %c0_21 = arith.constant 0 : index
    %22 = tpu.strided_load %arg0[%c21, %c0_21] {strides = array<i32: 2, 1>} : memref<38x16xf32, #tpu.memory_space<vmem>>, vector<9x16xf32>
    %c32_22 = arith.constant 32 : index
    %c0_23 = arith.constant 0 : index
    %23 = vector.load %arg1[%c32_22, %c0_23] : memref<48x8xf32, #tpu.memory_space<vmem>>, vector<16x8xf32>
    %cst_24 = arith.constant dense<0.000000e+00> : vector<9x8xf32>
    %24 = tpu.matmul %22, %23, %cst_24 {dimension_numbers = #tpu.dot_dimension_numbers<[1], [0], [0], [1], [0, 0, 1, 1], [], []>} : vector<9x16xf32>, vector<16x8xf32>, vector<9x8xf32> -> vector<9x8xf32>
    %25 = arith.addf %21, %24 : vector<9x8xf32>
    %26 = vector.broadcast %0 : vector<1x8xf32> to vector<9x8xf32>
    %27 = arith.addf %25, %26 : vector<9x8xf32>
    %c9 = arith.constant 9 : index
    %c0_25 = arith.constant 0 : index
    %28 = vector.load %arg12[%c9, %c0_25] : memref<18x8xf32, #tpu.memory_space<vmem>>, vector<9x8xf32>
    tpu.vector_store %arg12[%c9, %c0_25], %27 {strides = array<i32>} : memref<18x8xf32, #tpu.memory_space<vmem>>, vector<9x8xf32>,
    %c0_26 = arith.constant 0 : index
    %c0_27 = arith.constant 0 : index
    %29 = vector.load %arg4[%c0_26, %c0_27] : memref<1x12xf32, #tpu.memory_space<vmem>>, vector<1x12xf32>
    %c0_28 = arith.constant 0 : index
    %c0_29 = arith.constant 0 : index
    %30 = tpu.strided_load %arg12[%c0_28, %c0_29] {strides = array<i32: 2, 1>} : memref<18x8xf32, #tpu.memory_space<vmem>>, vector<4x8xf32>
    %c0_30 = arith.constant 0 : index
    %c0_31 = arith.constant 0 : index
    %31 = vector.load %arg3[%c0_30, %c0_31] : memref<24x12xf32, #tpu.memory_space<vmem>>, vector<8x12xf32>
    %cst_32 = arith.constant dense<0.000000e+00> : vector<4x12xf32>
    %32 = tpu.matmul %30, %31, %cst_32 {dimension_numbers = #tpu.dot_dimension_numbers<[1], [0], [0], [1], [0, 0, 1, 1], [], []>} : vector<4x8xf32>, vector<8x12xf32>, vector<4x12xf32> -> vector<4x12xf32>
    %c1_33 = arith.constant 1 : index
    %c0_34 = arith.constant 0 : index
    %33 = tpu.strided_load %arg12[%c1_33, %c0_34] {strides = array<i32: 2, 1>} : memref<18x8xf32, #tpu.memory_space<vmem>>, vector<4x8xf32>
    %c8 = arith.constant 8 : index
    %c0_35 = arith.constant 0 : index
    %34 = vector.load %arg3[%c8, %c0_35] : memref<24x12xf32, #tpu.memory_space<vmem>>, vector<8x12xf32>
    %cst_36 = arith.constant dense<0.000000e+00> : vector<4x12xf32>
    %35 = tpu.matmul %33, %34, %cst_36 {dimension_numbers = #tpu.dot_dimension_numbers<[1], [0], [0], [1], [0, 0, 1, 1], [], []>} : vector<4x8xf32>, vector<8x12xf32>, vector<4x12xf32> -> vector<4x12xf32>
    %36 = arith.addf %32, %35 : vector<4x12xf32>
    %c2_37 = arith.constant 2 : index
    %c0_38 = arith.constant 0 : index
    %37 = tpu.strided_load %arg12[%c2_37, %c0_38] {strides = array<i32: 2, 1>} : memref<18x8xf32, #tpu.memory_space<vmem>>, vector<4x8xf32>
    %c16_39 = arith.constant 16 : index
    %c0_40 = arith.constant 0 : index
    %38 = vector.load %arg3[%c16_39, %c0_40] : memref<24x12xf32, #tpu.memory_space<vmem>>, vector<8x12xf32>
    %cst_41 = arith.constant dense<0.000000e+00> : vector<4x12xf32>
    %39 = tpu.matmul %37, %38, %cst_41 {dimension_numbers = #tpu.dot_dimension_numbers<[1], [0], [0], [1], [0, 0, 1, 1], [], []>} : vector<4x8xf32>, vector<8x12xf32>, vector<4x12xf32> -> vector<4x12xf32>
    %40 = arith.addf %36, %39 : vector<4x12xf32>
    %41 = vector.broadcast %29 : vector<1x12xf32> to vector<4x12xf32>
    %42 = arith.addf %40, %41 : vector<4x12xf32>
    %c0_42 = arith.constant 0 : index
    %c0_43 = arith.constant 0 : index
    %43 = vector.load %arg13[%c0_42, %c0_43] : memref<8x12xf32, #tpu.memory_space<vmem>>, vector<4x12xf32>
    tpu.vector_store %arg13[%c0_42, %c0_43], %42 {strides = array<i32>} : memref<8x12xf32, #tpu.memory_space<vmem>>, vector<4x12xf32>,
    %c9_44 = arith.constant 9 : index
    %c0_45 = arith.constant 0 : index
    %44 = tpu.strided_load %arg12[%c9_44, %c0_45] {strides = array<i32: 2, 1>} : memref<18x8xf32, #tpu.memory_space<vmem>>, vector<4x8xf32>
    %c0_46 = arith.constant 0 : index
    %c0_47 = arith.constant 0 : index
    %45 = vector.load %arg3[%c0_46, %c0_47] : memref<24x12xf32, #tpu.memory_space<vmem>>, vector<8x12xf32>
    %cst_48 = arith.constant dense<0.000000e+00> : vector<4x12xf32>
    %46 = tpu.matmul %44, %45, %cst_48 {dimension_numbers = #tpu.dot_dimension_numbers<[1], [0], [0], [1], [0, 0, 1, 1], [], []>} : vector<4x8xf32>, vector<8x12xf32>, vector<4x12xf32> -> vector<4x12xf32>
    %c10 = arith.constant 10 : index
    %c0_49 = arith.constant 0 : index
    %47 = tpu.strided_load %arg12[%c10, %c0_49] {strides = array<i32: 2, 1>} : memref<18x8xf32, #tpu.memory_space<vmem>>, vector<4x8xf32>
    %c8_50 = arith.constant 8 : index
    %c0_51 = arith.constant 0 : index
    %48 = vector.load %arg3[%c8_50, %c0_51] : memref<24x12xf32, #tpu.memory_space<vmem>>, vector<8x12xf32>
    %cst_52 = arith.constant dense<0.000000e+00> : vector<4x12xf32>
    %49 = tpu.matmul %47, %48, %cst_52 {dimension_numbers = #tpu.dot_dimension_numbers<[1], [0], [0], [1], [0, 0, 1, 1], [], []>} : vector<4x8xf32>, vector<8x12xf32>, vector<4x12xf32> -> vector<4x12xf32>
    %50 = arith.addf %46, %49 : vector<4x12xf32>
    %c11 = arith.constant 11 : index
    %c0_53 = arith.constant 0 : index
    %51 = tpu.strided_load %arg12[%c11, %c0_53] {strides = array<i32: 2, 1>} : memref<18x8xf32, #tpu.memory_space<vmem>>, vector<4x8xf32>
    %c16_54 = arith.constant 16 : index
    %c0_55 = arith.constant 0 : index
    %52 = vector.load %arg3[%c16_54, %c0_55] : memref<24x12xf32, #tpu.memory_space<vmem>>, vector<8x12xf32>
    %cst_56 = arith.constant dense<0.000000e+00> : vector<4x12xf32>
    %53 = tpu.matmul %51, %52, %cst_56 {dimension_numbers = #tpu.dot_dimension_numbers<[1], [0], [0], [1], [0, 0, 1, 1], [], []>} : vector<4x8xf32>, vector<8x12xf32>, vector<4x12xf32> -> vector<4x12xf32>
    %54 = arith.addf %50, %53 : vector<4x12xf32>
    %55 = vector.broadcast %29 : vector<1x12xf32> to vector<4x12xf32>
    %56 = arith.addf %54, %55 : vector<4x12xf32>
    %c4 = arith.constant 4 : index
    %c0_57 = arith.constant 0 : index
    %57 = vector.load %arg13[%c4, %c0_57] : memref<8x12xf32, #tpu.memory_space<vmem>>, vector<4x12xf32>
    tpu.vector_store %arg13[%c4, %c0_57], %56 {strides = array<i32>} : memref<8x12xf32, #tpu.memory_space<vmem>>, vector<4x12xf32>,
    %c0_58 = arith.constant 0 : index
    %c0_59 = arith.constant 0 : index
    %58 = vector.load %arg6[%c0_58, %c0_59] : memref<1x16xf32, #tpu.memory_space<vmem>>, vector<1x16xf32>
    %c0_60 = arith.constant 0 : index
    %c0_61 = arith.constant 0 : index
    %59 = vector.load %arg13[%c0_60, %c0_61] : memref<8x12xf32, #tpu.memory_space<vmem>>, vector<1x12xf32>
    %c0_62 = arith.constant 0 : index
    %c0_63 = arith.constant 0 : index
    %60 = vector.load %arg5[%c0_62, %c0_63] : memref<48x16xf32, #tpu.memory_space<vmem>>, vector<12x16xf32>
    %cst_64 = arith.constant dense<0.000000e+00> : vector<1x16xf32>
    %61 = tpu.matmul %59, %60, %cst_64 {dimension_numbers = #tpu.dot_dimension_numbers<[1], [0], [0], [1], [0, 0, 1, 1], [], []>} : vector<1x12xf32>, vector<12x16xf32>, vector<1x16xf32> -> vector<1x16xf32>
    %c1_65 = arith.constant 1 : index
    %c0_66 = arith.constant 0 : index
    %62 = vector.load %arg13[%c1_65, %c0_66] : memref<8x12xf32, #tpu.memory_space<vmem>>, vector<1x12xf32>
    %c12 = arith.constant 12 : index
    %c0_67 = arith.constant 0 : index
    %63 = vector.load %arg5[%c12, %c0_67] : memref<48x16xf32, #tpu.memory_space<vmem>>, vector<12x16xf32>
    %cst_68 = arith.constant dense<0.000000e+00> : vector<1x16xf32>
    %64 = tpu.matmul %62, %63, %cst_68 {dimension_numbers = #tpu.dot_dimension_numbers<[1], [0], [0], [1], [0, 0, 1, 1], [], []>} : vector<1x12xf32>, vector<12x16xf32>, vector<1x16xf32> -> vector<1x16xf32>
    %65 = arith.addf %61, %64 : vector<1x16xf32>
    %c2_69 = arith.constant 2 : index
    %c0_70 = arith.constant 0 : index
    %66 = vector.load %arg13[%c2_69, %c0_70] : memref<8x12xf32, #tpu.memory_space<vmem>>, vector<1x12xf32>
    %c24 = arith.constant 24 : index
    %c0_71 = arith.constant 0 : index
    %67 = vector.load %arg5[%c24, %c0_71] : memref<48x16xf32, #tpu.memory_space<vmem>>, vector<12x16xf32>
    %cst_72 = arith.constant dense<0.000000e+00> : vector<1x16xf32>
    %68 = tpu.matmul %66, %67, %cst_72 {dimension_numbers = #tpu.dot_dimension_numbers<[1], [0], [0], [1], [0, 0, 1, 1], [], []>} : vector<1x12xf32>, vector<12x16xf32>, vector<1x16xf32> -> vector<1x16xf32>
    %69 = arith.addf %65, %68 : vector<1x16xf32>
    %c3 = arith.constant 3 : index
    %c0_73 = arith.constant 0 : index
    %70 = vector.load %arg13[%c3, %c0_73] : memref<8x12xf32, #tpu.memory_space<vmem>>, vector<1x12xf32>
    %c36 = arith.constant 36 : index
    %c0_74 = arith.constant 0 : index
    %71 = vector.load %arg5[%c36, %c0_74] : memref<48x16xf32, #tpu.memory_space<vmem>>, vector<12x16xf32>
    %cst_75 = arith.constant dense<0.000000e+00> : vector<1x16xf32>
    %72 = tpu.matmul %70, %71, %cst_75 {dimension_numbers = #tpu.dot_dimension_numbers<[1], [0], [0], [1], [0, 0, 1, 1], [], []>} : vector<1x12xf32>, vector<12x16xf32>, vector<1x16xf32> -> vector<1x16xf32>
    %73 = arith.addf %69, %72 : vector<1x16xf32>
    %74 = arith.addf %73, %58 : vector<1x16xf32>
    %c0_76 = arith.constant 0 : index
    %c0_77 = arith.constant 0 : index
    %75 = vector.load %arg14[%c0_76, %c0_77] : memref<2x16xf32, #tpu.memory_space<vmem>>, vector<1x16xf32>
    tpu.vector_store %arg14[%c0_76, %c0_77], %74 {strides = array<i32>} : memref<2x16xf32, #tpu.memory_space<vmem>>, vector<1x16xf32>,
    %c4_78 = arith.constant 4 : index
    %c0_79 = arith.constant 0 : index
    %76 = vector.load %arg13[%c4_78, %c0_79] : memref<8x12xf32, #tpu.memory_space<vmem>>, vector<1x12xf32>
    %c0_80 = arith.constant 0 : index
    %c0_81 = arith.constant 0 : index
    %77 = vector.load %arg5[%c0_80, %c0_81] : memref<48x16xf32, #tpu.memory_space<vmem>>, vector<12x16xf32>
    %cst_82 = arith.constant dense<0.000000e+00> : vector<1x16xf32>
    %78 = tpu.matmul %76, %77, %cst_82 {dimension_numbers = #tpu.dot_dimension_numbers<[1], [0], [0], [1], [0, 0, 1, 1], [], []>} : vector<1x12xf32>, vector<12x16xf32>, vector<1x16xf32> -> vector<1x16xf32>
    %c5 = arith.constant 5 : index
    %c0_83 = arith.constant 0 : index
    %79 = vector.load %arg13[%c5, %c0_83] : memref<8x12xf32, #tpu.memory_space<vmem>>, vector<1x12xf32>
    %c12_84 = arith.constant 12 : index
    %c0_85 = arith.constant 0 : index
    %80 = vector.load %arg5[%c12_84, %c0_85] : memref<48x16xf32, #tpu.memory_space<vmem>>, vector<12x16xf32>
    %cst_86 = arith.constant dense<0.000000e+00> : vector<1x16xf32>
    %81 = tpu.matmul %79, %80, %cst_86 {dimension_numbers = #tpu.dot_dimension_numbers<[1], [0], [0], [1], [0, 0, 1, 1], [], []>} : vector<1x12xf32>, vector<12x16xf32>, vector<1x16xf32> -> vector<1x16xf32>
    %82 = arith.addf %78, %81 : vector<1x16xf32>
    %c6 = arith.constant 6 : index
    %c0_87 = arith.constant 0 : index
    %83 = vector.load %arg13[%c6, %c0_87] : memref<8x12xf32, #tpu.memory_space<vmem>>, vector<1x12xf32>
    %c24_88 = arith.constant 24 : index
    %c0_89 = arith.constant 0 : index
    %84 = vector.load %arg5[%c24_88, %c0_89] : memref<48x16xf32, #tpu.memory_space<vmem>>, vector<12x16xf32>
    %cst_90 = arith.constant dense<0.000000e+00> : vector<1x16xf32>
    %85 = tpu.matmul %83, %84, %cst_90 {dimension_numbers = #tpu.dot_dimension_numbers<[1], [0], [0], [1], [0, 0, 1, 1], [], []>} : vector<1x12xf32>, vector<12x16xf32>, vector<1x16xf32> -> vector<1x16xf32>
    %86 = arith.addf %82, %85 : vector<1x16xf32>
    %c7 = arith.constant 7 : index
    %c0_91 = arith.constant 0 : index
    %87 = vector.load %arg13[%c7, %c0_91] : memref<8x12xf32, #tpu.memory_space<vmem>>, vector<1x12xf32>
    %c36_92 = arith.constant 36 : index
    %c0_93 = arith.constant 0 : index
    %88 = vector.load %arg5[%c36_92, %c0_93] : memref<48x16xf32, #tpu.memory_space<vmem>>, vector<12x16xf32>
    %cst_94 = arith.constant dense<0.000000e+00> : vector<1x16xf32>
    %89 = tpu.matmul %87, %88, %cst_94 {dimension_numbers = #tpu.dot_dimension_numbers<[1], [0], [0], [1], [0, 0, 1, 1], [], []>} : vector<1x12xf32>, vector<12x16xf32>, vector<1x16xf32> -> vector<1x16xf32>
    %90 = arith.addf %86, %89 : vector<1x16xf32>
    %91 = arith.addf %90, %58 : vector<1x16xf32>
    %c1_95 = arith.constant 1 : index
    %c0_96 = arith.constant 0 : index
    %92 = vector.load %arg14[%c1_95, %c0_96] : memref<2x16xf32, #tpu.memory_space<vmem>>, vector<1x16xf32>
    tpu.vector_store %arg14[%c1_95, %c0_96], %91 {strides = array<i32>} : memref<2x16xf32, #tpu.memory_space<vmem>>, vector<1x16xf32>,
    %c0_97 = arith.constant 0 : index
    %c0_98 = arith.constant 0 : index
    %93 = vector.load %arg14[%c0_97, %c0_98] : memref<2x16xf32, #tpu.memory_space<vmem>>, vector<2x16xf32>
    %c0_99 = arith.constant 0 : index
    %c0_100 = arith.constant 0 : index
    %94 = vector.load %arg7[%c0_99, %c0_100] : memref<16x48xf32, #tpu.memory_space<vmem>>, vector<16x48xf32>
    %cst_101 = arith.constant dense<0.000000e+00> : vector<2x48xf32>
    %95 = tpu.matmul %93, %94, %cst_101 {dimension_numbers = #tpu.dot_dimension_numbers<[1], [0], [0], [1], [0, 0, 1, 1], [], []>} : vector<2x16xf32>, vector<16x48xf32>, vector<2x48xf32> -> vector<2x48xf32>
    %96 = vector.extract_strided_slice %95 {offsets = [0, 0], sizes = [1, 12], strides = [1, 1]} : vector<2x48xf32> to vector<1x12xf32>
    %c0_102 = arith.constant 0 : index
    %c0_103 = arith.constant 0 : index
    %97 = vector.load %arg15[%c0_102, %c0_103] : memref<8x12xf32, #tpu.memory_space<vmem>>, vector<1x12xf32>
    tpu.vector_store %arg15[%c0_102, %c0_103], %96 {strides = array<i32>} : memref<8x12xf32, #tpu.memory_space<vmem>>, vector<1x12xf32>,
    %98 = vector.extract_strided_slice %95 {offsets = [0, 12], sizes = [1, 12], strides = [1, 1]} : vector<2x48xf32> to vector<1x12xf32>
    %c1_104 = arith.constant 1 : index
    %c0_105 = arith.constant 0 : index
    %99 = vector.load %arg15[%c1_104, %c0_105] : memref<8x12xf32, #tpu.memory_space<vmem>>, vector<1x12xf32>
    tpu.vector_store %arg15[%c1_104, %c0_105], %98 {strides = array<i32>} : memref<8x12xf32, #tpu.memory_space<vmem>>, vector<1x12xf32>,
    %100 = vector.extract_strided_slice %95 {offsets = [0, 24], sizes = [1, 12], strides = [1, 1]} : vector<2x48xf32> to vector<1x12xf32>
    %c2_106 = arith.constant 2 : index
    %c0_107 = arith.constant 0 : index
    %101 = vector.load %arg15[%c2_106, %c0_107] : memref<8x12xf32, #tpu.memory_space<vmem>>, vector<1x12xf32>
    tpu.vector_store %arg15[%c2_106, %c0_107], %100 {strides = array<i32>} : memref<8x12xf32, #tpu.memory_space<vmem>>, vector<1x12xf32>,
    %102 = vector.extract_strided_slice %95 {offsets = [0, 36], sizes = [1, 12], strides = [1, 1]} : vector<2x48xf32> to vector<1x12xf32>
    %c3_108 = arith.constant 3 : index
    %c0_109 = arith.constant 0 : index
    %103 = vector.load %arg15[%c3_108, %c0_109] : memref<8x12xf32, #tpu.memory_space<vmem>>, vector<1x12xf32>
    tpu.vector_store %arg15[%c3_108, %c0_109], %102 {strides = array<i32>} : memref<8x12xf32, #tpu.memory_space<vmem>>, vector<1x12xf32>,
    %104 = vector.extract_strided_slice %95 {offsets = [1, 0], sizes = [1, 12], strides = [1, 1]} : vector<2x48xf32> to vector<1x12xf32>
    %c4_110 = arith.constant 4 : index
    %c0_111 = arith.constant 0 : index
    %105 = vector.load %arg15[%c4_110, %c0_111] : memref<8x12xf32, #tpu.memory_space<vmem>>, vector<1x12xf32>
    tpu.vector_store %arg15[%c4_110, %c0_111], %104 {strides = array<i32>} : memref<8x12xf32, #tpu.memory_space<vmem>>, vector<1x12xf32>,
    %106 = vector.extract_strided_slice %95 {offsets = [1, 12], sizes = [1, 12], strides = [1, 1]} : vector<2x48xf32> to vector<1x12xf32>
    %c5_112 = arith.constant 5 : index
    %c0_113 = arith.constant 0 : index
    %107 = vector.load %arg15[%c5_112, %c0_113] : memref<8x12xf32, #tpu.memory_space<vmem>>, vector<1x12xf32>
    tpu.vector_store %arg15[%c5_112, %c0_113], %106 {strides = array<i32>} : memref<8x12xf32, #tpu.memory_space<vmem>>, vector<1x12xf32>,
    %108 = vector.extract_strided_slice %95 {offsets = [1, 24], sizes = [1, 12], strides = [1, 1]} : vector<2x48xf32> to vector<1x12xf32>
    %c6_114 = arith.constant 6 : index
    %c0_115 = arith.constant 0 : index
    %109 = vector.load %arg15[%c6_114, %c0_115] : memref<8x12xf32, #tpu.memory_space<vmem>>, vector<1x12xf32>
    tpu.vector_store %arg15[%c6_114, %c0_115], %108 {strides = array<i32>} : memref<8x12xf32, #tpu.memory_space<vmem>>, vector<1x12xf32>,
    %110 = vector.extract_strided_slice %95 {offsets = [1, 36], sizes = [1, 12], strides = [1, 1]} : vector<2x48xf32> to vector<1x12xf32>
    %c7_116 = arith.constant 7 : index
    %c0_117 = arith.constant 0 : index
    %111 = vector.load %arg15[%c7_116, %c0_117] : memref<8x12xf32, #tpu.memory_space<vmem>>, vector<1x12xf32>
    tpu.vector_store %arg15[%c7_116, %c0_117], %110 {strides = array<i32>} : memref<8x12xf32, #tpu.memory_space<vmem>>, vector<1x12xf32>,
    %c0_118 = arith.constant 0 : index
    %c0_119 = arith.constant 0 : index
    %112 = vector.load %arg15[%c0_118, %c0_119] : memref<8x12xf32, #tpu.memory_space<vmem>>, vector<8x12xf32>
    %c0_120 = arith.constant 0 : index
    %113 = memref.load %arg10[%c0_120] : memref<3xf32, #tpu.memory_space<smem>>
    %114 = vector.broadcast %113 : f32 to vector<8x12xf32>
    %115 = arith.addf %112, %114 : vector<8x12xf32>
    %c0_121 = arith.constant 0 : index
    %c0_122 = arith.constant 0 : index
    %116 = vector.load %arg8[%c0_121, %c0_122] : memref<12x24xf32, #tpu.memory_space<vmem>>, vector<12x24xf32>
    %cst_123 = arith.constant dense<0.000000e+00> : vector<8x24xf32>
    %117 = tpu.matmul %115, %116, %cst_123 {dimension_numbers = #tpu.dot_dimension_numbers<[1], [0], [0], [1], [0, 0, 1, 1], [], []>} : vector<8x12xf32>, vector<12x24xf32>, vector<8x24xf32> -> vector<8x24xf32>
    %118 = vector.extract_strided_slice %117 {offsets = [0, 0], sizes = [1, 8], strides = [1, 1]} : vector<8x24xf32> to vector<1x8xf32>
    %c0_124 = arith.constant 0 : index
    %c0_125 = arith.constant 0 : index
    %119 = vector.load %arg16[%c0_124, %c0_125] : memref<18x8xf32, #tpu.memory_space<vmem>>, vector<1x8xf32>
    tpu.vector_store %arg16[%c0_124, %c0_125], %118 {strides = array<i32>} : memref<18x8xf32, #tpu.memory_space<vmem>>, vector<1x8xf32>,
    %120 = vector.extract_strided_slice %117 {offsets = [0, 8], sizes = [1, 8], strides = [1, 1]} : vector<8x24xf32> to vector<1x8xf32>
    %c1_126 = arith.constant 1 : index
    %c0_127 = arith.constant 0 : index
    %121 = vector.load %arg16[%c1_126, %c0_127] : memref<18x8xf32, #tpu.memory_space<vmem>>, vector<1x8xf32>
    tpu.vector_store %arg16[%c1_126, %c0_127], %120 {strides = array<i32>} : memref<18x8xf32, #tpu.memory_space<vmem>>, vector<1x8xf32>,
    %122 = vector.extract_strided_slice %117 {offsets = [0, 16], sizes = [1, 8], strides = [1, 1]} : vector<8x24xf32> to vector<1x8xf32>
    %123 = vector.extract_strided_slice %117 {offsets = [1, 0], sizes = [1, 8], strides = [1, 1]} : vector<8x24xf32> to vector<1x8xf32>
    %124 = arith.addf %122, %123 : vector<1x8xf32>
    %c2_128 = arith.constant 2 : index
    %c0_129 = arith.constant 0 : index
    %125 = vector.load %arg16[%c2_128, %c0_129] : memref<18x8xf32, #tpu.memory_space<vmem>>, vector<1x8xf32>
    tpu.vector_store %arg16[%c2_128, %c0_129], %124 {strides = array<i32>} : memref<18x8xf32, #tpu.memory_space<vmem>>, vector<1x8xf32>,
    %126 = vector.extract_strided_slice %117 {offsets = [1, 8], sizes = [1, 8], strides = [1, 1]} : vector<8x24xf32> to vector<1x8xf32>
    %c3_130 = arith.constant 3 : index
    %c0_131 = arith.constant 0 : index
    %127 = vector.load %arg16[%c3_130, %c0_131] : memref<18x8xf32, #tpu.memory_space<vmem>>, vector<1x8xf32>
    tpu.vector_store %arg16[%c3_130, %c0_131], %126 {strides = array<i32>} : memref<18x8xf32, #tpu.memory_space<vmem>>, vector<1x8xf32>,
    %128 = vector.extract_strided_slice %117 {offsets = [1, 16], sizes = [1, 8], strides = [1, 1]} : vector<8x24xf32> to vector<1x8xf32>
    %129 = vector.extract_strided_slice %117 {offsets = [2, 0], sizes = [1, 8], strides = [1, 1]} : vector<8x24xf32> to vector<1x8xf32>
    %130 = arith.addf %128, %129 : vector<1x8xf32>
    %c4_132 = arith.constant 4 : index
    %c0_133 = arith.constant 0 : index
    %131 = vector.load %arg16[%c4_132, %c0_133] : memref<18x8xf32, #tpu.memory_space<vmem>>, vector<1x8xf32>
    tpu.vector_store %arg16[%c4_132, %c0_133], %130 {strides = array<i32>} : memref<18x8xf32, #tpu.memory_space<vmem>>, vector<1x8xf32>,
    %132 = vector.extract_strided_slice %117 {offsets = [2, 8], sizes = [1, 8], strides = [1, 1]} : vector<8x24xf32> to vector<1x8xf32>
    %c5_134 = arith.constant 5 : index
    %c0_135 = arith.constant 0 : index
    %133 = vector.load %arg16[%c5_134, %c0_135] : memref<18x8xf32, #tpu.memory_space<vmem>>, vector<1x8xf32>
    tpu.vector_store %arg16[%c5_134, %c0_135], %132 {strides = array<i32>} : memref<18x8xf32, #tpu.memory_space<vmem>>, vector<1x8xf32>,
    %134 = vector.extract_strided_slice %117 {offsets = [2, 16], sizes = [1, 8], strides = [1, 1]} : vector<8x24xf32> to vector<1x8xf32>
    %135 = vector.extract_strided_slice %117 {offsets = [3, 0], sizes = [1, 8], strides = [1, 1]} : vector<8x24xf32> to vector<1x8xf32>
    %136 = arith.addf %134, %135 : vector<1x8xf32>
    %c6_136 = arith.constant 6 : index
    %c0_137 = arith.constant 0 : index
    %137 = vector.load %arg16[%c6_136, %c0_137] : memref<18x8xf32, #tpu.memory_space<vmem>>, vector<1x8xf32>
    tpu.vector_store %arg16[%c6_136, %c0_137], %136 {strides = array<i32>} : memref<18x8xf32, #tpu.memory_space<vmem>>, vector<1x8xf32>,
    %138 = vector.extract_strided_slice %117 {offsets = [3, 8], sizes = [1, 8], strides = [1, 1]} : vector<8x24xf32> to vector<1x8xf32>
    %c7_138 = arith.constant 7 : index
    %c0_139 = arith.constant 0 : index
    %139 = vector.load %arg16[%c7_138, %c0_139] : memref<18x8xf32, #tpu.memory_space<vmem>>, vector<1x8xf32>
    tpu.vector_store %arg16[%c7_138, %c0_139], %138 {strides = array<i32>} : memref<18x8xf32, #tpu.memory_space<vmem>>, vector<1x8xf32>,
    %140 = vector.extract_strided_slice %117 {offsets = [3, 16], sizes = [1, 8], strides = [1, 1]} : vector<8x24xf32> to vector<1x8xf32>
    %c8_140 = arith.constant 8 : index
    %c0_141 = arith.constant 0 : index
    %141 = vector.load %arg16[%c8_140, %c0_141] : memref<18x8xf32, #tpu.memory_space<vmem>>, vector<1x8xf32>
    tpu.vector_store %arg16[%c8_140, %c0_141], %140 {strides = array<i32>} : memref<18x8xf32, #tpu.memory_space<vmem>>, vector<1x8xf32>,
    %142 = vector.extract_strided_slice %117 {offsets = [4, 0], sizes = [1, 8], strides = [1, 1]} : vector<8x24xf32> to vector<1x8xf32>
    %c9_142 = arith.constant 9 : index
    %c0_143 = arith.constant 0 : index
    %143 = vector.load %arg16[%c9_142, %c0_143] : memref<18x8xf32, #tpu.memory_space<vmem>>, vector<1x8xf32>
    tpu.vector_store %arg16[%c9_142, %c0_143], %142 {strides = array<i32>} : memref<18x8xf32, #tpu.memory_space<vmem>>, vector<1x8xf32>,
    %144 = vector.extract_strided_slice %117 {offsets = [4, 8], sizes = [1, 8], strides = [1, 1]} : vector<8x24xf32> to vector<1x8xf32>
    %c10_144 = arith.constant 10 : index
    %c0_145 = arith.constant 0 : index
    %145 = vector.load %arg16[%c10_144, %c0_145] : memref<18x8xf32, #tpu.memory_space<vmem>>, vector<1x8xf32>
    tpu.vector_store %arg16[%c10_144, %c0_145], %144 {strides = array<i32>} : memref<18x8xf32, #tpu.memory_space<vmem>>, vector<1x8xf32>,
    %146 = vector.extract_strided_slice %117 {offsets = [4, 16], sizes = [1, 8], strides = [1, 1]} : vector<8x24xf32> to vector<1x8xf32>
    %147 = vector.extract_strided_slice %117 {offsets = [5, 0], sizes = [1, 8], strides = [1, 1]} : vector<8x24xf32> to vector<1x8xf32>
    %148 = arith.addf %146, %147 : vector<1x8xf32>
    %c11_146 = arith.constant 11 : index
    %c0_147 = arith.constant 0 : index
    %149 = vector.load %arg16[%c11_146, %c0_147] : memref<18x8xf32, #tpu.memory_space<vmem>>, vector<1x8xf32>
    tpu.vector_store %arg16[%c11_146, %c0_147], %148 {strides = array<i32>} : memref<18x8xf32, #tpu.memory_space<vmem>>, vector<1x8xf32>,
    %150 = vector.extract_strided_slice %117 {offsets = [5, 8], sizes = [1, 8], strides = [1, 1]} : vector<8x24xf32> to vector<1x8xf32>
    %c12_148 = arith.constant 12 : index
    %c0_149 = arith.constant 0 : index
    %151 = vector.load %arg16[%c12_148, %c0_149] : memref<18x8xf32, #tpu.memory_space<vmem>>, vector<1x8xf32>
    tpu.vector_store %arg16[%c12_148, %c0_149], %150 {strides = array<i32>} : memref<18x8xf32, #tpu.memory_space<vmem>>, vector<1x8xf32>,
    %152 = vector.extract_strided_slice %117 {offsets = [5, 16], sizes = [1, 8], strides = [1, 1]} : vector<8x24xf32> to vector<1x8xf32>
    %153 = vector.extract_strided_slice %117 {offsets = [6, 0], sizes = [1, 8], strides = [1, 1]} : vector<8x24xf32> to vector<1x8xf32>
    %154 = arith.addf %152, %153 : vector<1x8xf32>
    %c13 = arith.constant 13 : index
    %c0_150 = arith.constant 0 : index
    %155 = vector.load %arg16[%c13, %c0_150] : memref<18x8xf32, #tpu.memory_space<vmem>>, vector<1x8xf32>
    tpu.vector_store %arg16[%c13, %c0_150], %154 {strides = array<i32>} : memref<18x8xf32, #tpu.memory_space<vmem>>, vector<1x8xf32>,
    %156 = vector.extract_strided_slice %117 {offsets = [6, 8], sizes = [1, 8], strides = [1, 1]} : vector<8x24xf32> to vector<1x8xf32>
    %c14 = arith.constant 14 : index
    %c0_151 = arith.constant 0 : index
    %157 = vector.load %arg16[%c14, %c0_151] : memref<18x8xf32, #tpu.memory_space<vmem>>, vector<1x8xf32>
    tpu.vector_store %arg16[%c14, %c0_151], %156 {strides = array<i32>} : memref<18x8xf32, #tpu.memory_space<vmem>>, vector<1x8xf32>,
    %158 = vector.extract_strided_slice %117 {offsets = [6, 16], sizes = [1, 8], strides = [1, 1]} : vector<8x24xf32> to vector<1x8xf32>
    %159 = vector.extract_strided_slice %117 {offsets = [7, 0], sizes = [1, 8], strides = [1, 1]} : vector<8x24xf32> to vector<1x8xf32>
    %160 = arith.addf %158, %159 : vector<1x8xf32>
    %c15 = arith.constant 15 : index
    %c0_152 = arith.constant 0 : index
    %161 = vector.load %arg16[%c15, %c0_152] : memref<18x8xf32, #tpu.memory_space<vmem>>, vector<1x8xf32>
    tpu.vector_store %arg16[%c15, %c0_152], %160 {strides = array<i32>} : memref<18x8xf32, #tpu.memory_space<vmem>>, vector<1x8xf32>,
    %162 = vector.extract_strided_slice %117 {offsets = [7, 8], sizes = [1, 8], strides = [1, 1]} : vector<8x24xf32> to vector<1x8xf32>
    %c16_153 = arith.constant 16 : index
    %c0_154 = arith.constant 0 : index
    %163 = vector.load %arg16[%c16_153, %c0_154] : memref<18x8xf32, #tpu.memory_space<vmem>>, vector<1x8xf32>
    tpu.vector_store %arg16[%c16_153, %c0_154], %162 {strides = array<i32>} : memref<18x8xf32, #tpu.memory_space<vmem>>, vector<1x8xf32>,
    %164 = vector.extract_strided_slice %117 {offsets = [7, 16], sizes = [1, 8], strides = [1, 1]} : vector<8x24xf32> to vector<1x8xf32>
    %c17 = arith.constant 17 : index
    %c0_155 = arith.constant 0 : index
    %165 = vector.load %arg16[%c17, %c0_155] : memref<18x8xf32, #tpu.memory_space<vmem>>, vector<1x8xf32>
    tpu.vector_store %arg16[%c17, %c0_155], %164 {strides = array<i32>} : memref<18x8xf32, #tpu.memory_space<vmem>>, vector<1x8xf32>,
    %c0_156 = arith.constant 0 : index
    %c0_157 = arith.constant 0 : index
    %166 = vector.load %arg16[%c0_156, %c0_157] : memref<18x8xf32, #tpu.memory_space<vmem>>, vector<18x8xf32>
    %c1_158 = arith.constant 1 : index
    %167 = memref.load %arg10[%c1_158] : memref<3xf32, #tpu.memory_space<smem>>
    %168 = vector.broadcast %167 : f32 to vector<18x8xf32>
    %169 = arith.addf %166, %168 : vector<18x8xf32>
    %c0_159 = arith.constant 0 : index
    %c0_160 = arith.constant 0 : index
    %170 = vector.load %arg9[%c0_159, %c0_160] : memref<8x48xf32, #tpu.memory_space<vmem>>, vector<8x48xf32>
    %cst_161 = arith.constant dense<0.000000e+00> : vector<18x48xf32>
    %171 = tpu.matmul %169, %170, %cst_161 {dimension_numbers = #tpu.dot_dimension_numbers<[1], [0], [0], [1], [0, 0, 1, 1], [], []>} : vector<18x8xf32>, vector<8x48xf32>, vector<18x48xf32> -> vector<18x48xf32>
    %172 = vector.extract_strided_slice %171 {offsets = [0, 0], sizes = [1, 16], strides = [1, 1]} : vector<18x48xf32> to vector<1x16xf32>
    %c0_162 = arith.constant 0 : index
    %c0_163 = arith.constant 0 : index
    %173 = vector.load %arg11[%c0_162, %c0_163] : memref<38x16xf32, #tpu.memory_space<vmem>>, vector<1x16xf32>
    tpu.vector_store %arg11[%c0_162, %c0_163], %172 {strides = array<i32>} : memref<38x16xf32, #tpu.memory_space<vmem>>, vector<1x16xf32>,
    %174 = vector.extract_strided_slice %171 {offsets = [0, 16], sizes = [1, 16], strides = [1, 1]} : vector<18x48xf32> to vector<1x16xf32>
    %c1_164 = arith.constant 1 : index
    %c0_165 = arith.constant 0 : index
    %175 = vector.load %arg11[%c1_164, %c0_165] : memref<38x16xf32, #tpu.memory_space<vmem>>, vector<1x16xf32>
    tpu.vector_store %arg11[%c1_164, %c0_165], %174 {strides = array<i32>} : memref<38x16xf32, #tpu.memory_space<vmem>>, vector<1x16xf32>,
    %176 = vector.extract_strided_slice %171 {offsets = [0, 32], sizes = [1, 16], strides = [1, 1]} : vector<18x48xf32> to vector<1x16xf32>
    %177 = vector.extract_strided_slice %171 {offsets = [1, 0], sizes = [1, 16], strides = [1, 1]} : vector<18x48xf32> to vector<1x16xf32>
    %178 = arith.addf %176, %177 : vector<1x16xf32>
    %c2_166 = arith.constant 2 : index
    %c0_167 = arith.constant 0 : index
    %179 = vector.load %arg11[%c2_166, %c0_167] : memref<38x16xf32, #tpu.memory_space<vmem>>, vector<1x16xf32>
    tpu.vector_store %arg11[%c2_166, %c0_167], %178 {strides = array<i32>} : memref<38x16xf32, #tpu.memory_space<vmem>>, vector<1x16xf32>,
    %180 = vector.extract_strided_slice %171 {offsets = [1, 16], sizes = [1, 16], strides = [1, 1]} : vector<18x48xf32> to vector<1x16xf32>
    %c3_168 = arith.constant 3 : index
    %c0_169 = arith.constant 0 : index
    %181 = vector.load %arg11[%c3_168, %c0_169] : memref<38x16xf32, #tpu.memory_space<vmem>>, vector<1x16xf32>
    tpu.vector_store %arg11[%c3_168, %c0_169], %180 {strides = array<i32>} : memref<38x16xf32, #tpu.memory_space<vmem>>, vector<1x16xf32>,
    %182 = vector.extract_strided_slice %171 {offsets = [1, 32], sizes = [1, 16], strides = [1, 1]} : vector<18x48xf32> to vector<1x16xf32>
    %183 = vector.extract_strided_slice %171 {offsets = [2, 0], sizes = [1, 16], strides = [1, 1]} : vector<18x48xf32> to vector<1x16xf32>
    %184 = arith.addf %182, %183 : vector<1x16xf32>
    %c4_170 = arith.constant 4 : index
    %c0_171 = arith.constant 0 : index
    %185 = vector.load %arg11[%c4_170, %c0_171] : memref<38x16xf32, #tpu.memory_space<vmem>>, vector<1x16xf32>
    tpu.vector_store %arg11[%c4_170, %c0_171], %184 {strides = array<i32>} : memref<38x16xf32, #tpu.memory_space<vmem>>, vector<1x16xf32>,
    %186 = vector.extract_strided_slice %171 {offsets = [2, 16], sizes = [1, 16], strides = [1, 1]} : vector<18x48xf32> to vector<1x16xf32>
    %c5_172 = arith.constant 5 : index
    %c0_173 = arith.constant 0 : index
    %187 = vector.load %arg11[%c5_172, %c0_173] : memref<38x16xf32, #tpu.memory_space<vmem>>, vector<1x16xf32>
    tpu.vector_store %arg11[%c5_172, %c0_173], %186 {strides = array<i32>} : memref<38x16xf32, #tpu.memory_space<vmem>>, vector<1x16xf32>,
    %188 = vector.extract_strided_slice %171 {offsets = [2, 32], sizes = [1, 16], strides = [1, 1]} : vector<18x48xf32> to vector<1x16xf32>
    %189 = vector.extract_strided_slice %171 {offsets = [3, 0], sizes = [1, 16], strides = [1, 1]} : vector<18x48xf32> to vector<1x16xf32>
    %190 = arith.addf %188, %189 : vector<1x16xf32>
    %c6_174 = arith.constant 6 : index
    %c0_175 = arith.constant 0 : index
    %191 = vector.load %arg11[%c6_174, %c0_175] : memref<38x16xf32, #tpu.memory_space<vmem>>, vector<1x16xf32>
    tpu.vector_store %arg11[%c6_174, %c0_175], %190 {strides = array<i32>} : memref<38x16xf32, #tpu.memory_space<vmem>>, vector<1x16xf32>,
    %192 = vector.extract_strided_slice %171 {offsets = [3, 16], sizes = [1, 16], strides = [1, 1]} : vector<18x48xf32> to vector<1x16xf32>
    %c7_176 = arith.constant 7 : index
    %c0_177 = arith.constant 0 : index
    %193 = vector.load %arg11[%c7_176, %c0_177] : memref<38x16xf32, #tpu.memory_space<vmem>>, vector<1x16xf32>
    tpu.vector_store %arg11[%c7_176, %c0_177], %192 {strides = array<i32>} : memref<38x16xf32, #tpu.memory_space<vmem>>, vector<1x16xf32>,
    %194 = vector.extract_strided_slice %171 {offsets = [3, 32], sizes = [1, 16], strides = [1, 1]} : vector<18x48xf32> to vector<1x16xf32>
    %195 = vector.extract_strided_slice %171 {offsets = [4, 0], sizes = [1, 16], strides = [1, 1]} : vector<18x48xf32> to vector<1x16xf32>
    %196 = arith.addf %194, %195 : vector<1x16xf32>
    %c8_178 = arith.constant 8 : index
    %c0_179 = arith.constant 0 : index
    %197 = vector.load %arg11[%c8_178, %c0_179] : memref<38x16xf32, #tpu.memory_space<vmem>>, vector<1x16xf32>
    tpu.vector_store %arg11[%c8_178, %c0_179], %196 {strides = array<i32>} : memref<38x16xf32, #tpu.memory_space<vmem>>, vector<1x16xf32>,
    %198 = vector.extract_strided_slice %171 {offsets = [4, 16], sizes = [1, 16], strides = [1, 1]} : vector<18x48xf32> to vector<1x16xf32>
    %c9_180 = arith.constant 9 : index
    %c0_181 = arith.constant 0 : index
    %199 = vector.load %arg11[%c9_180, %c0_181] : memref<38x16xf32, #tpu.memory_space<vmem>>, vector<1x16xf32>
    tpu.vector_store %arg11[%c9_180, %c0_181], %198 {strides = array<i32>} : memref<38x16xf32, #tpu.memory_space<vmem>>, vector<1x16xf32>,
    %200 = vector.extract_strided_slice %171 {offsets = [4, 32], sizes = [1, 16], strides = [1, 1]} : vector<18x48xf32> to vector<1x16xf32>
    %201 = vector.extract_strided_slice %171 {offsets = [5, 0], sizes = [1, 16], strides = [1, 1]} : vector<18x48xf32> to vector<1x16xf32>
    %202 = arith.addf %200, %201 : vector<1x16xf32>
    %c10_182 = arith.constant 10 : index
    %c0_183 = arith.constant 0 : index
    %203 = vector.load %arg11[%c10_182, %c0_183] : memref<38x16xf32, #tpu.memory_space<vmem>>, vector<1x16xf32>
    tpu.vector_store %arg11[%c10_182, %c0_183], %202 {strides = array<i32>} : memref<38x16xf32, #tpu.memory_space<vmem>>, vector<1x16xf32>,
    %204 = vector.extract_strided_slice %171 {offsets = [5, 16], sizes = [1, 16], strides = [1, 1]} : vector<18x48xf32> to vector<1x16xf32>
    %c11_184 = arith.constant 11 : index
    %c0_185 = arith.constant 0 : index
    %205 = vector.load %arg11[%c11_184, %c0_185] : memref<38x16xf32, #tpu.memory_space<vmem>>, vector<1x16xf32>
    tpu.vector_store %arg11[%c11_184, %c0_185], %204 {strides = array<i32>} : memref<38x16xf32, #tpu.memory_space<vmem>>, vector<1x16xf32>,
    %206 = vector.extract_strided_slice %171 {offsets = [5, 32], sizes = [1, 16], strides = [1, 1]} : vector<18x48xf32> to vector<1x16xf32>
    %207 = vector.extract_strided_slice %171 {offsets = [6, 0], sizes = [1, 16], strides = [1, 1]} : vector<18x48xf32> to vector<1x16xf32>
    %208 = arith.addf %206, %207 : vector<1x16xf32>
    %c12_186 = arith.constant 12 : index
    %c0_187 = arith.constant 0 : index
    %209 = vector.load %arg11[%c12_186, %c0_187] : memref<38x16xf32, #tpu.memory_space<vmem>>, vector<1x16xf32>
    tpu.vector_store %arg11[%c12_186, %c0_187], %208 {strides = array<i32>} : memref<38x16xf32, #tpu.memory_space<vmem>>, vector<1x16xf32>,
    %210 = vector.extract_strided_slice %171 {offsets = [6, 16], sizes = [1, 16], strides = [1, 1]} : vector<18x48xf32> to vector<1x16xf32>
    %c13_188 = arith.constant 13 : index
    %c0_189 = arith.constant 0 : index
    %211 = vector.load %arg11[%c13_188, %c0_189] : memref<38x16xf32, #tpu.memory_space<vmem>>, vector<1x16xf32>
    tpu.vector_store %arg11[%c13_188, %c0_189], %210 {strides = array<i32>} : memref<38x16xf32, #tpu.memory_space<vmem>>, vector<1x16xf32>,
    %212 = vector.extract_strided_slice %171 {offsets = [6, 32], sizes = [1, 16], strides = [1, 1]} : vector<18x48xf32> to vector<1x16xf32>
    %213 = vector.extract_strided_slice %171 {offsets = [7, 0], sizes = [1, 16], strides = [1, 1]} : vector<18x48xf32> to vector<1x16xf32>
    %214 = arith.addf %212, %213 : vector<1x16xf32>
    %c14_190 = arith.constant 14 : index
    %c0_191 = arith.constant 0 : index
    %215 = vector.load %arg11[%c14_190, %c0_191] : memref<38x16xf32, #tpu.memory_space<vmem>>, vector<1x16xf32>
    tpu.vector_store %arg11[%c14_190, %c0_191], %214 {strides = array<i32>} : memref<38x16xf32, #tpu.memory_space<vmem>>, vector<1x16xf32>,
    %216 = vector.extract_strided_slice %171 {offsets = [7, 16], sizes = [1, 16], strides = [1, 1]} : vector<18x48xf32> to vector<1x16xf32>
    %c15_192 = arith.constant 15 : index
    %c0_193 = arith.constant 0 : index
    %217 = vector.load %arg11[%c15_192, %c0_193] : memref<38x16xf32, #tpu.memory_space<vmem>>, vector<1x16xf32>
    tpu.vector_store %arg11[%c15_192, %c0_193], %216 {strides = array<i32>} : memref<38x16xf32, #tpu.memory_space<vmem>>, vector<1x16xf32>,
    %218 = vector.extract_strided_slice %171 {offsets = [7, 32], sizes = [1, 16], strides = [1, 1]} : vector<18x48xf32> to vector<1x16xf32>
    %219 = vector.extract_strided_slice %171 {offsets = [8, 0], sizes = [1, 16], strides = [1, 1]} : vector<18x48xf32> to vector<1x16xf32>
    %220 = arith.addf %218, %219 : vector<1x16xf32>
    %c16_194 = arith.constant 16 : index
    %c0_195 = arith.constant 0 : index
    %221 = vector.load %arg11[%c16_194, %c0_195] : memref<38x16xf32, #tpu.memory_space<vmem>>, vector<1x16xf32>
    tpu.vector_store %arg11[%c16_194, %c0_195], %220 {strides = array<i32>} : memref<38x16xf32, #tpu.memory_space<vmem>>, vector<1x16xf32>,
    %222 = vector.extract_strided_slice %171 {offsets = [8, 16], sizes = [1, 16], strides = [1, 1]} : vector<18x48xf32> to vector<1x16xf32>
    %c17_196 = arith.constant 17 : index
    %c0_197 = arith.constant 0 : index
    %223 = vector.load %arg11[%c17_196, %c0_197] : memref<38x16xf32, #tpu.memory_space<vmem>>, vector<1x16xf32>
    tpu.vector_store %arg11[%c17_196, %c0_197], %222 {strides = array<i32>} : memref<38x16xf32, #tpu.memory_space<vmem>>, vector<1x16xf32>,
    %224 = vector.extract_strided_slice %171 {offsets = [8, 32], sizes = [1, 16], strides = [1, 1]} : vector<18x48xf32> to vector<1x16xf32>
    %c18 = arith.constant 18 : index
    %c0_198 = arith.constant 0 : index
    %225 = vector.load %arg11[%c18, %c0_198] : memref<38x16xf32, #tpu.memory_space<vmem>>, vector<1x16xf32>
    tpu.vector_store %arg11[%c18, %c0_198], %224 {strides = array<i32>} : memref<38x16xf32, #tpu.memory_space<vmem>>, vector<1x16xf32>,
    %226 = vector.extract_strided_slice %171 {offsets = [9, 0], sizes = [1, 16], strides = [1, 1]} : vector<18x48xf32> to vector<1x16xf32>
    %c19_199 = arith.constant 19 : index
    %c0_200 = arith.constant 0 : index
    %227 = vector.load %arg11[%c19_199, %c0_200] : memref<38x16xf32, #tpu.memory_space<vmem>>, vector<1x16xf32>
    tpu.vector_store %arg11[%c19_199, %c0_200], %226 {strides = array<i32>} : memref<38x16xf32, #tpu.memory_space<vmem>>, vector<1x16xf32>,
    %228 = vector.extract_strided_slice %171 {offsets = [9, 16], sizes = [1, 16], strides = [1, 1]} : vector<18x48xf32> to vector<1x16xf32>
    %c20_201 = arith.constant 20 : index
    %c0_202 = arith.constant 0 : index
    %229 = vector.load %arg11[%c20_201, %c0_202] : memref<38x16xf32, #tpu.memory_space<vmem>>, vector<1x16xf32>
    tpu.vector_store %arg11[%c20_201, %c0_202], %228 {strides = array<i32>} : memref<38x16xf32, #tpu.memory_space<vmem>>, vector<1x16xf32>,
    %230 = vector.extract_strided_slice %171 {offsets = [9, 32], sizes = [1, 16], strides = [1, 1]} : vector<18x48xf32> to vector<1x16xf32>
    %231 = vector.extract_strided_slice %171 {offsets = [10, 0], sizes = [1, 16], strides = [1, 1]} : vector<18x48xf32> to vector<1x16xf32>
    %232 = arith.addf %230, %231 : vector<1x16xf32>
    %c21_203 = arith.constant 21 : index
    %c0_204 = arith.constant 0 : index
    %233 = vector.load %arg11[%c21_203, %c0_204] : memref<38x16xf32, #tpu.memory_space<vmem>>, vector<1x16xf32>
    tpu.vector_store %arg11[%c21_203, %c0_204], %232 {strides = array<i32>} : memref<38x16xf32, #tpu.memory_space<vmem>>, vector<1x16xf32>,
    %234 = vector.extract_strided_slice %171 {offsets = [10, 16], sizes = [1, 16], strides = [1, 1]} : vector<18x48xf32> to vector<1x16xf32>
    %c22 = arith.constant 22 : index
    %c0_205 = arith.constant 0 : index
    %235 = vector.load %arg11[%c22, %c0_205] : memref<38x16xf32, #tpu.memory_space<vmem>>, vector<1x16xf32>
    tpu.vector_store %arg11[%c22, %c0_205], %234 {strides = array<i32>} : memref<38x16xf32, #tpu.memory_space<vmem>>, vector<1x16xf32>,
    %236 = vector.extract_strided_slice %171 {offsets = [10, 32], sizes = [1, 16], strides = [1, 1]} : vector<18x48xf32> to vector<1x16xf32>
    %237 = vector.extract_strided_slice %171 {offsets = [11, 0], sizes = [1, 16], strides = [1, 1]} : vector<18x48xf32> to vector<1x16xf32>
    %238 = arith.addf %236, %237 : vector<1x16xf32>
    %c23 = arith.constant 23 : index
    %c0_206 = arith.constant 0 : index
    %239 = vector.load %arg11[%c23, %c0_206] : memref<38x16xf32, #tpu.memory_space<vmem>>, vector<1x16xf32>
    tpu.vector_store %arg11[%c23, %c0_206], %238 {strides = array<i32>} : memref<38x16xf32, #tpu.memory_space<vmem>>, vector<1x16xf32>,
    %240 = vector.extract_strided_slice %171 {offsets = [11, 16], sizes = [1, 16], strides = [1, 1]} : vector<18x48xf32> to vector<1x16xf32>
    %c24_207 = arith.constant 24 : index
    %c0_208 = arith.constant 0 : index
    %241 = vector.load %arg11[%c24_207, %c0_208] : memref<38x16xf32, #tpu.memory_space<vmem>>, vector<1x16xf32>
    tpu.vector_store %arg11[%c24_207, %c0_208], %240 {strides = array<i32>} : memref<38x16xf32, #tpu.memory_space<vmem>>, vector<1x16xf32>,
    %242 = vector.extract_strided_slice %171 {offsets = [11, 32], sizes = [1, 16], strides = [1, 1]} : vector<18x48xf32> to vector<1x16xf32>
    %243 = vector.extract_strided_slice %171 {offsets = [12, 0], sizes = [1, 16], strides = [1, 1]} : vector<18x48xf32> to vector<1x16xf32>
    %244 = arith.addf %242, %243 : vector<1x16xf32>
    %c25 = arith.constant 25 : index
    %c0_209 = arith.constant 0 : index
    %245 = vector.load %arg11[%c25, %c0_209] : memref<38x16xf32, #tpu.memory_space<vmem>>, vector<1x16xf32>
    tpu.vector_store %arg11[%c25, %c0_209], %244 {strides = array<i32>} : memref<38x16xf32, #tpu.memory_space<vmem>>, vector<1x16xf32>,
    %246 = vector.extract_strided_slice %171 {offsets = [12, 16], sizes = [1, 16], strides = [1, 1]} : vector<18x48xf32> to vector<1x16xf32>
    %c26 = arith.constant 26 : index
    %c0_210 = arith.constant 0 : index
    %247 = vector.load %arg11[%c26, %c0_210] : memref<38x16xf32, #tpu.memory_space<vmem>>, vector<1x16xf32>
    tpu.vector_store %arg11[%c26, %c0_210], %246 {strides = array<i32>} : memref<38x16xf32, #tpu.memory_space<vmem>>, vector<1x16xf32>,
    %248 = vector.extract_strided_slice %171 {offsets = [12, 32], sizes = [1, 16], strides = [1, 1]} : vector<18x48xf32> to vector<1x16xf32>
    %249 = vector.extract_strided_slice %171 {offsets = [13, 0], sizes = [1, 16], strides = [1, 1]} : vector<18x48xf32> to vector<1x16xf32>
    %250 = arith.addf %248, %249 : vector<1x16xf32>
    %c27 = arith.constant 27 : index
    %c0_211 = arith.constant 0 : index
    %251 = vector.load %arg11[%c27, %c0_211] : memref<38x16xf32, #tpu.memory_space<vmem>>, vector<1x16xf32>
    tpu.vector_store %arg11[%c27, %c0_211], %250 {strides = array<i32>} : memref<38x16xf32, #tpu.memory_space<vmem>>, vector<1x16xf32>,
    %252 = vector.extract_strided_slice %171 {offsets = [13, 16], sizes = [1, 16], strides = [1, 1]} : vector<18x48xf32> to vector<1x16xf32>
    %c28 = arith.constant 28 : index
    %c0_212 = arith.constant 0 : index
    %253 = vector.load %arg11[%c28, %c0_212] : memref<38x16xf32, #tpu.memory_space<vmem>>, vector<1x16xf32>
    tpu.vector_store %arg11[%c28, %c0_212], %252 {strides = array<i32>} : memref<38x16xf32, #tpu.memory_space<vmem>>, vector<1x16xf32>,
    %254 = vector.extract_strided_slice %171 {offsets = [13, 32], sizes = [1, 16], strides = [1, 1]} : vector<18x48xf32> to vector<1x16xf32>
    %255 = vector.extract_strided_slice %171 {offsets = [14, 0], sizes = [1, 16], strides = [1, 1]} : vector<18x48xf32> to vector<1x16xf32>
    %256 = arith.addf %254, %255 : vector<1x16xf32>
    %c29 = arith.constant 29 : index
    %c0_213 = arith.constant 0 : index
    %257 = vector.load %arg11[%c29, %c0_213] : memref<38x16xf32, #tpu.memory_space<vmem>>, vector<1x16xf32>
    tpu.vector_store %arg11[%c29, %c0_213], %256 {strides = array<i32>} : memref<38x16xf32, #tpu.memory_space<vmem>>, vector<1x16xf32>,
    %258 = vector.extract_strided_slice %171 {offsets = [14, 16], sizes = [1, 16], strides = [1, 1]} : vector<18x48xf32> to vector<1x16xf32>
    %c30 = arith.constant 30 : index
    %c0_214 = arith.constant 0 : index
    %259 = vector.load %arg11[%c30, %c0_214] : memref<38x16xf32, #tpu.memory_space<vmem>>, vector<1x16xf32>
    tpu.vector_store %arg11[%c30, %c0_214], %258 {strides = array<i32>} : memref<38x16xf32, #tpu.memory_space<vmem>>, vector<1x16xf32>,
    %260 = vector.extract_strided_slice %171 {offsets = [14, 32], sizes = [1, 16], strides = [1, 1]} : vector<18x48xf32> to vector<1x16xf32>
    %261 = vector.extract_strided_slice %171 {offsets = [15, 0], sizes = [1, 16], strides = [1, 1]} : vector<18x48xf32> to vector<1x16xf32>
    %262 = arith.addf %260, %261 : vector<1x16xf32>
    %c31 = arith.constant 31 : index
    %c0_215 = arith.constant 0 : index
    %263 = vector.load %arg11[%c31, %c0_215] : memref<38x16xf32, #tpu.memory_space<vmem>>, vector<1x16xf32>
    tpu.vector_store %arg11[%c31, %c0_215], %262 {strides = array<i32>} : memref<38x16xf32, #tpu.memory_space<vmem>>, vector<1x16xf32>,
    %264 = vector.extract_strided_slice %171 {offsets = [15, 16], sizes = [1, 16], strides = [1, 1]} : vector<18x48xf32> to vector<1x16xf32>
    %c32_216 = arith.constant 32 : index
    %c0_217 = arith.constant 0 : index
    %265 = vector.load %arg11[%c32_216, %c0_217] : memref<38x16xf32, #tpu.memory_space<vmem>>, vector<1x16xf32>
    tpu.vector_store %arg11[%c32_216, %c0_217], %264 {strides = array<i32>} : memref<38x16xf32, #tpu.memory_space<vmem>>, vector<1x16xf32>,
    %266 = vector.extract_strided_slice %171 {offsets = [15, 32], sizes = [1, 16], strides = [1, 1]} : vector<18x48xf32> to vector<1x16xf32>
    %267 = vector.extract_strided_slice %171 {offsets = [16, 0], sizes = [1, 16], strides = [1, 1]} : vector<18x48xf32> to vector<1x16xf32>
    %268 = arith.addf %266, %267 : vector<1x16xf32>
    %c33 = arith.constant 33 : index
    %c0_218 = arith.constant 0 : index
    %269 = vector.load %arg11[%c33, %c0_218] : memref<38x16xf32, #tpu.memory_space<vmem>>, vector<1x16xf32>
    tpu.vector_store %arg11[%c33, %c0_218], %268 {strides = array<i32>} : memref<38x16xf32, #tpu.memory_space<vmem>>, vector<1x16xf32>,
    %270 = vector.extract_strided_slice %171 {offsets = [16, 16], sizes = [1, 16], strides = [1, 1]} : vector<18x48xf32> to vector<1x16xf32>
    %c34 = arith.constant 34 : index
    %c0_219 = arith.constant 0 : index
    %271 = vector.load %arg11[%c34, %c0_219] : memref<38x16xf32, #tpu.memory_space<vmem>>, vector<1x16xf32>
    tpu.vector_store %arg11[%c34, %c0_219], %270 {strides = array<i32>} : memref<38x16xf32, #tpu.memory_space<vmem>>, vector<1x16xf32>,
    %272 = vector.extract_strided_slice %171 {offsets = [16, 32], sizes = [1, 16], strides = [1, 1]} : vector<18x48xf32> to vector<1x16xf32>
    %273 = vector.extract_strided_slice %171 {offsets = [17, 0], sizes = [1, 16], strides = [1, 1]} : vector<18x48xf32> to vector<1x16xf32>
    %274 = arith.addf %272, %273 : vector<1x16xf32>
    %c35 = arith.constant 35 : index
    %c0_220 = arith.constant 0 : index
    %275 = vector.load %arg11[%c35, %c0_220] : memref<38x16xf32, #tpu.memory_space<vmem>>, vector<1x16xf32>
    tpu.vector_store %arg11[%c35, %c0_220], %274 {strides = array<i32>} : memref<38x16xf32, #tpu.memory_space<vmem>>, vector<1x16xf32>,
    %276 = vector.extract_strided_slice %171 {offsets = [17, 16], sizes = [1, 16], strides = [1, 1]} : vector<18x48xf32> to vector<1x16xf32>
    %c36_221 = arith.constant 36 : index
    %c0_222 = arith.constant 0 : index
    %277 = vector.load %arg11[%c36_221, %c0_222] : memref<38x16xf32, #tpu.memory_space<vmem>>, vector<1x16xf32>
    tpu.vector_store %arg11[%c36_221, %c0_222], %276 {strides = array<i32>} : memref<38x16xf32, #tpu.memory_space<vmem>>, vector<1x16xf32>,
    %278 = vector.extract_strided_slice %171 {offsets = [17, 32], sizes = [1, 16], strides = [1, 1]} : vector<18x48xf32> to vector<1x16xf32>
    %c37 = arith.constant 37 : index
    %c0_223 = arith.constant 0 : index
    %279 = vector.load %arg11[%c37, %c0_223] : memref<38x16xf32, #tpu.memory_space<vmem>>, vector<1x16xf32>
    tpu.vector_store %arg11[%c37, %c0_223], %278 {strides = array<i32>} : memref<38x16xf32, #tpu.memory_space<vmem>>, vector<1x16xf32>,
    %c0_224 = arith.constant 0 : index
    %c0_225 = arith.constant 0 : index
    %280 = vector.load %arg11[%c0_224, %c0_225] : memref<38x16xf32, #tpu.memory_space<vmem>>, vector<38x16xf32>
    %c2_226 = arith.constant 2 : index
    %281 = memref.load %arg10[%c2_226] : memref<3xf32, #tpu.memory_space<smem>>
    %282 = vector.broadcast %281 : f32 to vector<38x16xf32>
    %283 = arith.addf %280, %282 : vector<38x16xf32>
    %c0_227 = arith.constant 0 : index
    %c0_228 = arith.constant 0 : index
    %284 = vector.load %arg11[%c0_227, %c0_228] : memref<38x16xf32, #tpu.memory_space<vmem>>, vector<38x16xf32>
    tpu.vector_store %arg11[%c0_227, %c0_228], %283 {strides = array<i32>} : memref<38x16xf32, #tpu.memory_space<vmem>>, vector<38x16xf32>,
    return
  }
}

</mosaic_0001>

<bundles_post_ra>
// kernel: autoencoder_forward.1
= control target key start
LH: loop header
LB: loop body
LE: loop exit
PB: predicated region body
PF: predicated region fallthrough
CT: control target
= control target key end

     0   :  { %16 = vsyncpa [#allocation8], 0  ;;  %s3066_s0 = inlined_call_operand.vmem [shape: f32[38,16], index: 0, kind: input, shape index: {}]   ;;  %s3067_s1 = inlined_call_operand.vmem [shape: f32[48,8], index: 1, kind: input, shape index: {}]   ;;  %s3068_s2 = inlined_call_operand.vmem [shape: f32[1,8], index: 2, kind: input, shape index: {}]   ;;  %s3069_s3 = inlined_call_operand.vmem [shape: f32[24,12], index: 3, kind: input, shape index: {}]   ;;  %s3070_s4 = inlined_call_operand.vmem [shape: f32[1,12], index: 4, kind: input, shape index: {}]   ;;  %s3071_s5 = inlined_call_operand.vmem [shape: f32[48,16], index: 5, kind: input, shape index: {}]   ;;  %s3072_s6 = inlined_call_operand.vmem [shape: f32[1,16], index: 6, kind: input, shape index: {}]   ;;  %s3073_s7 = inlined_call_operand.vmem [shape: f32[16,48], index: 7, kind: input, shape index: {}]   ;;  %s3074_s8 = inlined_call_operand.vmem [shape: f32[12,24], index: 8, kind: input, shape index: {}]   ;;  %s3075_s9 = inlined_call_operand.vmem [shape: f32[8,48], index: 9, kind: input, shape index: {}]   ;;  %s3076_s10 = inlined_call_operand.vmem [shape: f32[3], index: 10, kind: input, shape index: {}]   ;;  %s3077_s11 = inlined_call_operand.vmem [shape: f32[38,16], index: 11, kind: output, shape index: {}]  }
   0x1   :  { %s43_s19 = sshll.u32 %s3076_s10, 4  ;;  %s44_s19 = int_to_ptr.vmem [resolvable:$true] %s43_s19 }
   0x2   :  { %s2509_s20 = scalar_lea.vmem %s44_s19, 16  ;;  %p2514_p1 = scmp.lt.s32.totalorder %s44_s19, %s44_s19 }
   0x3   :  { %p2510_p0 = scmp.ne.s32.totalorder %s44_s19, %s2509_s20  ;;  %p2515_p2 = scmp.lt.s32.totalorder %s2509_s20, %s2509_s20 }
   0x5   :  { %p2516_p3 = por %p2515_p2, %p2514_p1 }
   0x7   :  { %p2517_p4 = pnand %p2516_p3, %p2510_p0 }
   0x9   :  { %2520 = shalt.err (!%p2517_p4)
}
   0xa   :  { %s2523_s21 = smov [#allocation7]  }
   0xb   :  { %46 = dma.vmem_to_smem %s44_s19, 16, %s2523_s21, [#allocation8]  }
   0xc   :  { %2521 = dma.done.wait [#allocation8], 16  }
   0xd   :  { %2522 = vsyncadd [#allocation8], 4294967280 }
   0xe   :  { %50 = sfence }
   0xf   :  { %v61_v0 = vld [vmem:[%s3067_s1 + $0x10] sm:$0xff]  ;;  %v62_v1 = vld [vmem:[%s3067_s1 + $0x18] sm:$0xff]  ;;  %v55_v2 = vld [vmem:[%s3067_s1] sm:$0xff]  ;;  %vm63_vm0 = vcmask 130048   ;;  %v2524_v21 = vmov 0.0   ;;  %vm2525_vm1 = vmmov 0  }
  0x10   :  { %v2425_v3 = vpack.c.bf16 %v62_v1, %v61_v0  ;;  %v56_v4 = vld [vmem:[%s3067_s1 + $0x8] sm:$0xff]  ;;  %v230_v8 = vld [vmem:[%s3067_s1 + $0x20] sm:$0xff]  ;;  %v2149_v10 = vld [vmem:[%s3066_s0 + $0x11] ss:$2 sm:$0x1]  ;;  %vm325_vm2 = vcmask 57344  }
  0x11   :  { %v2148_v5 = vld [vmem:[%s3066_s0 + $0x1] ss:$2 sm:$0xff]  ;;  %v52_v6 = vld [vmem:[%s3066_s0] ss:$2 sm:$0xff]  ;;  %v2429_v7 = vpack.c.bf16 %v56_v4, %v55_v2  ;;  %vm323_vm3 = vcmask 64512   ;;  %v748_v36 = vld [vmem:[%s3069_s3 + $0x10] sm:$0xff] }
  0x12   :  { %2276 = vmatprep.mubr.msk.f32.mxu1 %vm63_vm0, %v2148_v5  ;;  %2283 = vmatprep.mubr.msk.f32.mxu0 %vm63_vm0, %v52_v6  ;;  %v231_v9 = vld [vmem:[%s3067_s1 + $0x28] sm:$0xff]  ;;  %v2147_v12 = vld [vmem:[%s3066_s0 + $0x10] ss:$2 sm:$0x1]  ;;  %v2161_v13 = vld [vmem:[%s3066_s0 + $0x14] ss:$2 sm:$0xff] }
  0x13   :  { %2426 = vmatprep.subr.bf16.mxu1 %v2425_v3  ;;  %2430 = vmatprep.subr.bf16.mxu0 %v2429_v7  ;;  %v2433_v11 = vpack.c.bf16 %v231_v9, %v230_v8  ;;  %v2154_v14 = vld [vmem:[%s3066_s0 + $0x2] ss:$2 sm:$0xff]  ;;  %v2159_v16 = vld [vmem:[%s3066_s0 + $0x13] ss:$2 sm:$0xff]  ;;  %v2158_v26 = vld [vmem:[%s3068_s2] ss:$0 sm:$0xff] }
  0x14   :  { %2428 = vmatpush3.bf16.msra.mxu1 %v2425_v3  ;;  %2432 = vmatpush3.bf16.msra.mxu0 %v2429_v7  ;;  %v2162_v15 = vld [vmem:[%s3066_s0 + $0x24] ss:$2 sm:$0x1]  ;;  %v2155_v17 = vld [vmem:[%s3066_s0 + $0x12] ss:$2 sm:$0x1] }
  0x15   :  { %2438 = vmatprep.subr.bf16.mxu1 %v2425_v3  ;;  %2434 = vmatprep.subr.bf16.mxu0 %v2433_v11  ;;  %v2160_v18 = vld [vmem:[%s3066_s0 + $0x23] ss:$2 sm:$0x1]  ;;  %v2168_v20 = vld [vmem:[%s3066_s0 + $0x25] ss:$2 sm:$0x1] }
  0x16   :  { %v2167_v19 = vld [vmem:[%s3066_s0 + $0x15] ss:$2 sm:$0xff]  ;;  %v599_v22 = vld [vmem:[%s3069_s3 + $0x8] sm:$0xff]  ;;  %v2526_v44 = vmov 0.0|0.0   ;;  %vm1074_vm4 = vcmask 1043456   ;;  %vm2527_vm5 = vmmov 1  }
  0x17   :  { %2277 = vmatmul.mubr.msk.f32.vlgmr.msra.gmra.mrb[0].mxu1 %vm63_vm0, %v2149_v10  ;;  %2284 = vmatmul.mubr.msk.f32.vlgmr.msra.gmra.mrb[0].mxu0 %vm63_vm0, %v2147_v12  ;;  %v596_v23 = vld [vmem:[%s3069_s3] sm:$0xff]  ;;  %v2714_v45 = vld [vmem:[%s3071_s5 + $0xc] sm:$0xff]  ;;  %v1069_v46 = vld [vmem:[%s3071_s5 + $0x14] sm:$0xf]  ;;  %vm830_vm7 = vcmask 93184   ;;  %vm1070_vm8 = vcmask 97280  }
  0x18   :  { %2440 = vmatpush3.bf16.msra.mxu1 %v2425_v3  ;;  %2436 = vmatpush3.bf16.msra.mxu0 %v2433_v11  ;;  %v1065_v47 = vld [vmem:[%s3071_s5] sm:$0xff]  ;;  %v2450_v48 = vpack.c.bf16 %v1069_v46, %v2714_v45  ;;  %v1066_v49 = vld [vmem:[%s3071_s5 + $0x8] sm:$0xf]  ;;  %vm2726_vm6 = vmpackc.low %vm1074_vm4, %vm2527_vm5  ;;  %vm1385_vm9 = vcmask 122880   ;;  %vm1783_vm10 = vcmask 90112   ;;  %vm1798_vm11 = vcmask 91137  }
  0x19   :  { %2297 = vmatprep.mubr.msk.f32.mxu1 %vm63_vm0, %v2161_v13  ;;  %2442 = vmatprep.subr.bf16.mxu1 %v2429_v7  ;;  %v2454_v51 = vpack.c.bf16 %v1066_v49, %v1065_v47  ;;  %v2174_v57 = vld [vmem:[%s3070_s4] ss:$0 sm:$0xff]  ;;  %v1225_v3 = vld [vmem:[%s3071_s5 + $0x18] sm:$0xff]  ;;  %v1305_v5 = vld [vmem:[%s3071_s5 + $0x24] sm:$0xff]  ;;  %s2528_s28 = smov 92   ;;  %s2529_s29 = smov 116  }
  0x1a   :  { %2290 = vmatprep.mubr.msk.f32.mxu0 %vm63_vm0, %v2154_v14  ;;  %2314 = vmatprep.subr.mxu0 %v2524_v21  ;;  %v1226_v4 = vld [vmem:[%s3071_s5 + $0x20] sm:$0xf]  ;;  %v1306_v6 = vld [vmem:[%s3071_s5 + $0x2c] sm:$0xf]  ;;  %v1392_v12 = vld [vmem:[%s3071_s5 + $0x14] sm:$0xf] }
  0x1b   :  { %2298 = vmatmul.mubr.msk.f32.vlgmr.msra.gmra.mrb[2].mxu1 %vm63_vm0, %v2162_v15  ;;  %v2458_v10 = vpack.c.bf16 %v1226_v4, %v1225_v3  ;;  %v1389_v13 = vld [vmem:[%s3071_s5 + $0x8] sm:$0xf]  ;;  %s2530_s30 = smov 104   ;;  %vm1913_vm12 = vcmask 61444   ;;  %s2531_s12 = smov 120   ;;  %vm1907_vm13 = vcmask 60419  }
  0x1c   :  { %2444 = vmatpush3.bf16.msra.mxu1 %v2429_v7  ;;  %2304 = vmatprep.mubr.msk.f32.mxu1 %vm63_vm0, %v2159_v16  ;;  %s2532_s13 = smov 16   ;;  %s2533_s14 = smov 112   ;;  %vm1923_vm14 = vcmask 64519   ;;  %vm1901_vm15 = vcmask 58369   ;;  %vm1904_vm4 = vcmask 59394   ;;  %vm1917_vm5 = vcmask 62469  }
  0x1d   :  { %2446 = vmatprep.subr.bf16.mxu1 %v2433_v11  ;;  %s2534_s18 = smov 32   ;;  %s2535_s0 = smov 96  }
  0x1e   :  { %s2201_s10 = sld [smem:[#allocation7 + $0x2]] }
  0x1f   :  { %2291 = vmatmul.mubr.msk.f32.vlgmr.msra.gmra.mrb[0].mxu0 %vm63_vm0, %v2155_v17  ;;  %v2466_v17 = vpack.c.bf16 %v1392_v12, %v2714_v45 }
  0x20   :  { %2315 = vmatpush3.msra.mxu0 %v599_v22  ;;  %2316 = vmatprep.mubr.msk.f32.mxu0 %vm2525_vm1, %v2524_v21 }
  0x21   :  { %2324 = vmatprep.subr.mxu0 %v2524_v21 }
  0x23   :  { %2305 = vmatmul.mubr.msk.f32.vlgmr.msra.gmra.mrb[2].mxu1 %vm63_vm0, %v2160_v18  ;;  %v2470_v18 = vpack.c.bf16 %v1389_v13, %v1065_v47 }
  0x24   :  { %2448 = vmatpush3.bf16.msra.mxu1 %v2433_v11  ;;  %2311 = vmatprep.mubr.msk.f32.mxu1 %vm63_vm0, %v2167_v19  ;;  %v2462_v11 = vpack.c.bf16 %v1306_v6, %v1305_v5  ;;  %v1547_v19 = vld [vmem:[%s3071_s5 + $0x20] sm:$0xf] }
  0x25   :  { %2319 = vmatprep.subr.mxu1 %v2524_v21 }
  0x2b   :  { %2312 = vmatmul.mubr.msk.f32.vlgmr.msra.gmra.mrb[2].mxu1 %vm63_vm0, %v2168_v20 }
  0x2c   :  { %2320 = vmatpush3.msra.mxu1 %v596_v23  ;;  %2321 = vmatprep.mubr.msk.f32.mxu1 %vm2525_vm1, %v2524_v21 }
  0x2d   :  { %2329 = vmatprep.subr.mxu1 %v2524_v21 }
  0xea   :  { %v2278_v24 = vpop.f32.mrb[0].mxu1 }
  0xeb   :  { %v136_v25 = vpop.f32.mrb[1].mxu1 }
  0xf2   :  { %v2292_v27 = vpop.f32.mrb[0].mxu0 }
  0xf3   :  { %v2488_v28 = vadd.f32 %v2292_v27, %v2278_v24  ;;  %v304_v29 = vpop.f32.mrb[1].mxu0  ;;  %v2474_v24 = vpack.c.bf16 %v1547_v19, %v1225_v3 }
  0xf4   :  { %v2489_v30 = vadd.f32 %v304_v29, %v136_v25 }
  0xf5   :  { %v322_v31 = vadd.f32 %v2488_v28, %v2158_v26 }
  0xf6   :  { %v321_v32 = vadd.f32 %v2489_v30, %v2158_v26  ;;  %v1708_v30 = vld [vmem:[%s3073_s7] sm:$0xff] }
  0xf7   :  { %326 = vst.msk [vmem:[#allocation2 + $0x8] sm:$0x1] %vm325_vm2, %v322_v31  ;;  %v1709_v31 = vld [vmem:[%s3073_s7 + $0x8] sm:$0xff] }
  0xf8   :  { %324 = vst.msk [vmem:[#allocation2] sm:$0xff] %vm323_vm3, %v321_v32  ;;  %v2482_v32 = vpack.c.bf16 %v1709_v31, %v1708_v30 }
  0xfe   :  { %v2313_v33 = vpop.f32.mrb[2].mxu1 }
  0xff   :  { %v591_v34 = vadd.f32 %v2313_v33, %v2158_v26  ;;  %v579_v35 = vpop.f32.mrb[3].mxu1  ;;  %v598_v38 = vld [vmem:[#allocation2 + $0x1] ss:$2 sm:$0xf] }
 0x100   :  { %v590_v37 = vadd.f32 %v2158_v26, %v579_v35  ;;  %v595_v39 = vld [vmem:[#allocation2] ss:$2 sm:$0xf]  ;;  %2317 = vmatmul.mubr.msk.f32.vlgmr.msra.gmra.mrb[2].mxu0 %vm323_vm3, %v598_v38 }
 0x101   :  { %593 = vst.msk [vmem:[#allocation2 + $0x11] sm:$0x1] %vm325_vm2, %v591_v34  ;;  %2322 = vmatmul.mubr.msk.f32.vlgmr.msra.gmra.mrb[4].mxu1 %vm323_vm3, %v595_v39  ;;  %2325 = vmatpush3.msra.mxu0 %v748_v36  ;;  %v747_v40 = vld [vmem:[#allocation2 + $0x2] ss:$2 sm:$0xf] }
 0x102   :  { %592 = vst.msk [vmem:[#allocation2 + $0x9] sm:$0xff] %vm323_vm3, %v590_v37  ;;  %2326 = vmatprep.mubr.msk.f32.mxu0 %vm2525_vm1, %v2524_v21  ;;  %2330 = vmatpush3.msra.mxu1 %v599_v22 }
 0x103   :  { %2334 = vmatprep.subr.mxu0 %v2524_v21  ;;  %2331 = vmatprep.mubr.msk.f32.mxu1 %vm2525_vm1, %v2524_v21 }
 0x104   :  { %2339 = vmatprep.subr.mxu1 %v2524_v21  ;;  %2327 = vmatmul.mubr.msk.f32.vlgmr.msra.gmra.mrb[4].mxu0 %vm323_vm3, %v747_v40 }
 0x105   :  { %2335 = vmatpush3.msra.mxu0 %v596_v23  ;;  %2336 = vmatprep.mubr.msk.f32.mxu0 %vm2525_vm1, %v2524_v21  ;;  %v1627_v23 = vld [vmem:[%s3071_s5 + $0x2c] sm:$0xf] }
 0x106   :  { %2449 = vmatprep.subr.bf16.mxu0 %v2526_v44  ;;  %v2478_v25 = vpack.c.bf16 %v1627_v23, %v1305_v5 }
 0x109   :  { %v836_v41 = vld [vmem:[#allocation2 + $0xa] ss:$2 sm:$0xf]  ;;  %v833_v42 = vld [vmem:[#allocation2 + $0x9] ss:$2 sm:$0xf] }
 0x10a   :  { %2332 = vmatmul.mubr.msk.f32.vlgmr.msra.gmra.mrb[6].mxu1 %vm323_vm3, %v836_v41  ;;  %2337 = vmatmul.mubr.msk.f32.vlgmr.msra.gmra.mrb[6].mxu0 %vm323_vm3, %v833_v42  ;;  %v985_v43 = vld [vmem:[#allocation2 + $0xb] ss:$2 sm:$0xf] }
 0x10b   :  { %2340 = vmatpush3.msra.mxu1 %v748_v36  ;;  %2341 = vmatprep.mubr.msk.f32.mxu1 %vm2525_vm1, %v2524_v21 }
 0x10c   :  { %2348 = vmatprep.mubr.msk.f32.mxu0 %vm2525_vm1, %v2524_v21  ;;  %2453 = vmatprep.subr.bf16.mxu1 %v2526_v44 }
 0x10d   :  { %2452 = vmatpush3.bf16.msk.msra.mxu0 %vm2726_vm6, %v2450_v48 }
 0x10e   :  { %2342 = vmatmul.mubr.msk.f32.vlgmr.msra.gmra.mrb[8].mxu1 %vm323_vm3, %v985_v43  ;;  %2457 = vmatprep.subr.bf16.mxu0 %v2526_v44  ;;  %v1063_v43 = vld [vmem:[%s3072_s6] sm:$0x1] }
 0x10f   :  { %2355 = vmatprep.mubr.msk.f32.mxu1 %vm2525_vm1, %v2524_v21  ;;  %2456 = vmatpush3.bf16.msk.msra.mxu1 %vm2726_vm6, %v2454_v51 }
 0x110   :  { %2461 = vmatprep.subr.bf16.mxu1 %v2526_v44 }
 0x1d3   :  { %v669_v52 = vpop.f32.mrb[2].mxu0 }
 0x1d4   :  { %v742_v53 = vpop.f32.mrb[4].mxu1  ;;  %v2318_v55 = vpop.f32.mrb[3].mxu0 }
 0x1d5   :  { %v743_v54 = vadd.f32 %v742_v53, %v669_v52  ;;  %v2323_v56 = vpop.f32.mrb[5].mxu1 }
 0x1d7   :  { %v818_v58 = vpop.f32.mrb[4].mxu0 }
 0x1d8   :  { %v822_v59 = vadd.f32 %v818_v58, %v743_v54  ;;  %v2328_v60 = vpop.f32.mrb[5].mxu0 }
 0x1d9   :  { %v1807_v60 = vld [vmem:[%s3074_s8] sm:$0xff] }
 0x1da   :  { %v829_v61 = vadd.f32 %v2174_v57, %v822_v59 }
 0x1dc   :  { %831 = vst.msk [vmem:[#allocation3] sm:$0xf] %vm830_vm7, %v829_v61  ;;  %v1808_v61 = vld [vmem:[%s3074_s8 + $0x8] sm:$0xf]  ;;  %s1804_s8 = sld [smem:[#allocation7]] }
 0x1dd   :  { %v907_v62 = vpop.f32.mrb[6].mxu1  ;;  %v980_v63 = vpop.f32.mrb[6].mxu0 }
 0x1de   :  { %v981_v0 = vadd.f32 %v980_v63, %v907_v62  ;;  %v2333_v1 = vpop.f32.mrb[7].mxu1  ;;  %v2338_v2 = vpop.f32.mrb[7].mxu0  ;;  %v2485_v62 = vpack.c.bf16 %v1808_v61, %v1807_v60 }
 0x1e1   :  { %v1056_v7 = vpop.f32.mrb[8].mxu1 }
 0x1e2   :  { %v1060_v8 = vadd.f32 %v1056_v7, %v981_v0  ;;  %v2343_v9 = vpop.f32.mrb[9].mxu1  ;;  %v1805_v3 = vstv %s1804_s8 }
 0x1e3   :  { %v1067_v15 = vld [vmem:[#allocation3 + $0x1] sm:$0x1]  ;;  %v1064_v16 = vld [vmem:[#allocation3] sm:$0x1]  ;;  %v1224_v20 = vld [vmem:[#allocation3 + $0x2] sm:$0x1] }
 0x1e4   :  { %v1061_v14 = vadd.f32 %v2174_v57, %v1060_v8  ;;  %2349 = vmatmul.mubr.msk.f32.vlgmr.msra.gmra.mrb[8].mxu0 %vm1070_vm8, %v1067_v15  ;;  %2356 = vmatmul.mubr.msk.f32.vlgmr.msra.gmra.mrb[10].mxu1 %vm1070_vm8, %v1064_v16  ;;  %v1304_v22 = vld [vmem:[#allocation3 + $0x3] sm:$0x1]  ;;  %v1934_v9 = vld [vmem:[%s3075_s9] sm:$0xff]  ;;  %s2197_s9 = sld [smem:[#allocation7 + $0x1]] }
 0x1e5   :  { %2460 = vmatpush3.bf16.msk.msra.mxu0 %vm2726_vm6, %v2458_v10  ;;  %2464 = vmatpush3.bf16.msk.msra.mxu1 %vm2726_vm6, %v2462_v11 }
 0x1e6   :  { %1062 = vst.msk [vmem:[#allocation3 + $0x4] sm:$0xf] %vm830_vm7, %v1061_v14  ;;  %2362 = vmatprep.mubr.msk.f32.mxu0 %vm2525_vm1, %v2524_v21  ;;  %2369 = vmatprep.mubr.msk.f32.mxu1 %vm2525_vm1, %v2524_v21  ;;  %vm2049_vm7 = vcmask 126980  }
 0x1e7   :  { %2465 = vmatprep.subr.bf16.mxu0 %v2526_v44  ;;  %2469 = vmatprep.subr.bf16.mxu1 %v2526_v44 }
 0x1e8   :  { %2363 = vmatmul.mubr.msk.f32.vlgmr.msra.gmra.mrb[10].mxu0 %vm1070_vm8, %v1224_v20  ;;  %2370 = vmatmul.mubr.msk.f32.vlgmr.msra.gmra.mrb[12].mxu1 %vm1070_vm8, %v1304_v22 }
 0x1e9   :  { %2468 = vmatpush3.bf16.msk.msra.mxu0 %vm2726_vm6, %v2466_v17  ;;  %2472 = vmatpush3.bf16.msk.msra.mxu1 %vm2726_vm6, %v2470_v18 }
 0x1ea   :  { %2376 = vmatprep.mubr.msk.f32.mxu0 %vm2525_vm1, %v2524_v21  ;;  %2383 = vmatprep.mubr.msk.f32.mxu1 %vm2525_vm1, %v2524_v21  ;;  %v1930_v16 = vstv %s2197_s9 }
 0x1eb   :  { %2473 = vmatprep.subr.bf16.mxu0 %v2526_v44  ;;  %2477 = vmatprep.subr.bf16.mxu1 %v2526_v44 }
 0x1ed   :  { %v1390_v26 = vld [vmem:[#allocation3 + $0x5] sm:$0x1]  ;;  %v1387_v27 = vld [vmem:[#allocation3 + $0x4] sm:$0x1]  ;;  %v1545_v28 = vld [vmem:[#allocation3 + $0x6] sm:$0x1] }
 0x1ee   :  { %2377 = vmatmul.mubr.msk.f32.vlgmr.msra.gmra.mrb[12].mxu0 %vm1070_vm8, %v1390_v26  ;;  %2384 = vmatmul.mubr.msk.f32.vlgmr.msra.gmra.mrb[14].mxu1 %vm1070_vm8, %v1387_v27  ;;  %v1625_v29 = vld [vmem:[#allocation3 + $0x7] sm:$0x1] }
 0x1ef   :  { %2476 = vmatpush3.bf16.msk.msra.mxu0 %vm2726_vm6, %v2474_v24  ;;  %2480 = vmatpush3.bf16.msk.msra.mxu1 %vm2726_vm6, %v2478_v25 }
 0x1f0   :  { %2390 = vmatprep.mubr.msk.f32.mxu0 %vm2525_vm1, %v2524_v21  ;;  %2397 = vmatprep.mubr.msk.f32.mxu1 %vm2525_vm1, %v2524_v21 }
 0x1f1   :  { %2481 = vmatprep.subr.bf16.mxu0 %v2526_v44  ;;  %2484 = vmatprep.subr.bf16.mxu1 %v2526_v44 }
 0x1f2   :  { %2391 = vmatmul.mubr.msk.f32.vlgmr.msra.gmra.mrb[14].mxu0 %vm1070_vm8, %v1545_v28  ;;  %2398 = vmatmul.mubr.msk.f32.vlgmr.msra.gmra.mrb[16].mxu1 %vm1070_vm8, %v1625_v29 }
 0x1f3   :  { %2404 = vmatprep.mubr.msk.f32.mxu0 %vm2525_vm1, %v2524_v21  ;;  %2411 = vmatprep.mubr.msk.f32.mxu1 %vm2525_vm1, %v2524_v21 }
 0x1f4   :  { %2483 = vmatpush3.bf16.msra.mxu0 %v2482_v32  ;;  %2487 = vmatpush3.bf16.msk.msra.mxu1 %vm2726_vm6, %v2485_v62  ;;  %vm1920_vm6 = vcmask 63494  }
 0x1f5   :  { %2414 = vmatprep.subr.mxu0 %v2524_v21 }
 0x2b7   :  { %v1144_v33 = vpop.f32.mrb[8].mxu0  ;;  %v1220_v34 = vpop.f32.mrb[10].mxu1 }
 0x2b8   :  { %v1221_v35 = vadd.f32 %v1220_v34, %v1144_v33  ;;  %v2350_v36 = vpop.f32.mrb[9].mxu0  ;;  %v2357_v37 = vpop.f32.mrb[11].mxu1 }
 0x2bb   :  { %v1299_v38 = vpop.f32.mrb[10].mxu0  ;;  %v1379_v39 = vpop.f32.mrb[12].mxu1 }
 0x2bc   :  { %v1303_v40 = vadd.f32 %v1299_v38, %v1221_v35  ;;  %v2364_v41 = vpop.f32.mrb[11].mxu0  ;;  %v2371_v42 = vpop.f32.mrb[13].mxu1 }
 0x2be   :  { %v1383_v44 = vadd.f32 %v1379_v39, %v1303_v40 }
 0x2c0   :  { %v1384_v45 = vadd.f32 %v1383_v44, %v1063_v43 }
 0x2c1   :  { %v1465_v46 = vpop.f32.mrb[12].mxu0  ;;  %v1541_v47 = vpop.f32.mrb[14].mxu1 }
 0x2c2   :  { %v1542_v48 = vadd.f32 %v1541_v47, %v1465_v46  ;;  %v2378_v49 = vpop.f32.mrb[13].mxu0  ;;  %v2385_v51 = vpop.f32.mrb[15].mxu1  ;;  %1386 = vst.msk [vmem:[#allocation4] sm:$0x1] %vm1385_vm9, %v1384_v45  ;;  %v2130_v46 = vstv %s2201_s10 }
 0x2c5   :  { %v1620_v52 = vpop.f32.mrb[14].mxu0  ;;  %v1700_v53 = vpop.f32.mrb[16].mxu1 }
 0x2c6   :  { %v1624_v54 = vadd.f32 %v1620_v52, %v1542_v48  ;;  %v2392_v55 = vpop.f32.mrb[15].mxu0  ;;  %v2399_v56 = vpop.f32.mrb[17].mxu1 }
 0x2c8   :  { %v1704_v57 = vadd.f32 %v1700_v53, %v1624_v54 }
 0x2ca   :  { %v1705_v58 = vadd.f32 %v1704_v57, %v1063_v43 }
 0x2cc   :  { %1706 = vst.msk [vmem:[#allocation4 + $0x1] sm:$0x1] %vm1385_vm9, %v1705_v58 }
 0x2d3   :  { %v1707_v59 = vld [vmem:[#allocation4] sm:$0x3] }
 0x2d4   :  { %2405 = vmatmul.mubr.msk.f32.vlgmr.msra.gmra.mrb[16].mxu0 %vm63_vm0, %v1707_v59 }
 0x2d5   :  { %2416 = vmatprep.mubr.msk.f32.mxu0 %vm2525_vm1, %v2524_v21  ;;  %2415 = vmatpush3.msra.mxu0 %v1934_v9 }
 0x3a7   :  { %v1779_v63 = vpop.f32.mrb[16].mxu0 }
 0x3a8   :  { %1794 = vrot.lane.b32.xlu1 %v1779_v63, %s2528_s28  ;;  %1786 = vrot.lane.b32.xlu0 %v1779_v63, %s2529_s29  ;;  %v2406_v0 = vpop.f32.mrb[17].mxu0  ;;  %1784 = vst.msk [vmem:[#allocation5] sm:$0x1] %vm1783_vm10, %v1779_v63 }
 0x3a9   :  { %1799 = vst.msk [vmem:[#allocation5 + $0x3] sm:$0x2] %vm1798_vm11, %v1779_v63 }
 0x3ac   :  { %1790 = vrot.lane.b32.xlu0 %v1779_v63, %s2530_s30 }
 0x41a   :  { %v1795_v1 = vpop.permute.xlu1 %1794  ;;  %v1787_v2 = vpop.permute.xlu0 %1786 }
 0x41b   :  { %1797 = vst.msk [vmem:[#allocation5 + $0x3] sm:$0x1] %vm1783_vm10, %v1795_v1  ;;  %1789 = vst.msk [vmem:[#allocation5 + $0x1] sm:$0x1] %vm1783_vm10, %v1787_v2 }
 0x41c   :  { %1802 = vst.msk [vmem:[#allocation5 + $0x6] sm:$0x2] %vm1798_vm11, %v1795_v1  ;;  %1800 = vst.msk [vmem:[#allocation5 + $0x4] sm:$0x2] %vm1798_vm11, %v1787_v2 }
 0x41e   :  { %v1791_v50 = vpop.permute.xlu0 %1790 }
 0x41f   :  { %1793 = vst.msk [vmem:[#allocation5 + $0x2] sm:$0x1] %vm1783_vm10, %v1791_v50  ;;  %vm2055_vm10 = vcmask 129030  }
 0x420   :  { %1801 = vst.msk [vmem:[#allocation5 + $0x5] sm:$0x2] %vm1798_vm11, %v1791_v50  ;;  %vm2058_vm11 = vcmask 130055  }
 0x427   :  { %v1803_v4 = vld [vmem:[#allocation5] sm:$0xff] }
 0x428   :  { %v1806_v5 = vadd.f32 %v1805_v3, %v1803_v4 }
 0x42a   :  { %2412 = vmatmul.mubr.msk.f32.vlgmr.msra.gmra.mrb[18].mxu1 %vm1070_vm8, %v1806_v5  ;;  %vm2052_vm8 = vcmask 128005  }
 0x4fd   :  { %v1881_v6 = vpop.f32.mrb[18].mxu1 }
 0x4fe   :  { %1885 = vst.msk [vmem:[#allocation6] sm:$0x1] %vm325_vm2, %v1881_v6  ;;  %1887 = vrot.lane.b32.xlu0 %v1881_v6, %s2531_s12  ;;  %v2413_v7 = vpop.f32.mrb[19].mxu1  ;;  %v1891_v8 = vrot.slane %v1881_v6, 1 }
 0x4ff   :  { %1914 = vst.msk [vmem:[#allocation6 + $0x5] sm:$0x10] %vm1913_vm12, %v1881_v6 }
 0x500   :  { %1892 = vrot.lane.b32.xlu1 %v1891_v8, %s2532_s13 }
 0x502   :  { %1909 = vrot.lane.b32.xlu0 %v1881_v6, %s2533_s14 }
 0x570   :  { %v1888_v10 = vpop.permute.xlu0 %1887 }
 0x571   :  { %1890 = vst.msk [vmem:[#allocation6 + $0x1] sm:$0x1] %vm325_vm2, %v1888_v10 }
 0x572   :  { %1915 = vst.msk [vmem:[#allocation6 + $0x6] sm:$0x10] %vm1913_vm12, %v1888_v10  ;;  %v1893_v11 = vpop.permute.xlu1 %1892 }
 0x573   :  { %1908 = vst.msk [vmem:[#allocation6 + $0x4] sm:$0x8] %vm1907_vm13, %v1888_v10  ;;  %v1895_v12 = vadd.f32 %v1893_v11, %v1881_v6 }
 0x574   :  { %1924 = vst.msk [vmem:[#allocation6 + $0x9] sm:$0x80] %vm1923_vm14, %v1888_v10  ;;  %v1910_v13 = vpop.permute.xlu0 %1909 }
 0x575   :  { %1902 = vst.msk [vmem:[#allocation6 + $0x2] sm:$0x2] %vm1901_vm15, %v1888_v10  ;;  %1897 = vrot.lane.b32.xlu1 %v1895_v12, %s2533_s14 }
 0x576   :  { %1905 = vst.msk [vmem:[#allocation6 + $0x3] sm:$0x4] %vm1904_vm4, %v1888_v10 }
 0x577   :  { %1918 = vst.msk [vmem:[#allocation6 + $0x7] sm:$0x20] %vm1917_vm5, %v1888_v10 }
 0x578   :  { %1921 = vst.msk [vmem:[#allocation6 + $0x8] sm:$0x40] %vm1920_vm6, %v1888_v10 }
 0x579   :  { %1912 = vst.msk [vmem:[#allocation6 + $0x5] sm:$0x8] %vm1907_vm13, %v1910_v13 }
 0x57a   :  { %1925 = vst.msk [vmem:[#allocation6 + $0xa] sm:$0x80] %vm1923_vm14, %v1910_v13 }
 0x581   :  { %v1928_v20 = vld [vmem:[#allocation6 + $0x10] sm:$0x3] }
 0x582   :  { %v1933_v22 = vadd.f32 %v1930_v16, %v1928_v20 }
 0x5e7   :  { %v1898_v14 = vpop.permute.xlu1 %1897 }
 0x5e8   :  { %1900 = vst.msk [vmem:[#allocation6 + $0x2] sm:$0x1] %vm325_vm2, %v1898_v14  ;;  %vm2040_vm2 = vcmask 123905  }
 0x5e9   :  { %1903 = vst.msk [vmem:[#allocation6 + $0x3] sm:$0x2] %vm1901_vm15, %v1898_v14 }
 0x5ea   :  { %1906 = vst.msk [vmem:[#allocation6 + $0x4] sm:$0x4] %vm1904_vm4, %v1898_v14 }
 0x5eb   :  { %1916 = vst.msk [vmem:[#allocation6 + $0x7] sm:$0x10] %vm1913_vm12, %v1898_v14  ;;  %vm2140_vm12 = vcmask 128000  }
 0x5ec   :  { %1919 = vst.msk [vmem:[#allocation6 + $0x8] sm:$0x20] %vm1917_vm5, %v1898_v14 }
 0x5ed   :  { %1922 = vst.msk [vmem:[#allocation6 + $0x9] sm:$0x40] %vm1920_vm6, %v1898_v14 }
 0x5f1   :  { %v1926_v15 = vld [vmem:[#allocation6] sm:$0xff] }
 0x5f2   :  { %v1931_v17 = vadd.f32 %v1930_v16, %v1926_v15 }
 0x5f4   :  { %v1927_v18 = vld [vmem:[#allocation6 + $0x8] sm:$0xff]  ;;  %2417 = vmatmul.mubr.msk.f32.vlgmr.msra.gmra.mrb[18].mxu0 %vm323_vm3, %v1931_v17 }
 0x5f5   :  { %2419 = vmatprep.mubr.msk.f32.mxu0 %vm2525_vm1, %v2524_v21  ;;  %v1932_v19 = vadd.f32 %v1930_v16, %v1927_v18 }
 0x5f8   :  { %2420 = vmatmul.mubr.msk.f32.gmra.mrb[20].mxu0 %vm323_vm3, %v1932_v19 }
 0x5f9   :  { %2422 = vmatprep.mubr.msk.f32.mxu0 %vm2525_vm1, %v2524_v21  ;;  %vm2043_vm1 = vcmask 124930  }
 0x5fc   :  { %2423 = vmatmul.mubr.msk.f32.gmra.mrb[22].mxu0 %vm323_vm3, %v1933_v22  ;;  %vm2046_vm3 = vcmask 125955  }
 0x6c7   :  { %v2010_v23 = vpop.f32.mrb[18].mxu0 }
 0x6c8   :  { %2024 = vst.msk [vmem:[%s3077_s11] sm:$0x1] %vm1385_vm9, %v2010_v23  ;;  %v2418_v24 = vpop.f32.mrb[19].mxu0  ;;  %v2030_v25 = vrot.slane %v2010_v23, 1 }
 0x6ca   :  { %2031 = vrot.lane.b32.xlu1 %v2030_v25, %s2534_s18 }
 0x6cb   :  { %v2015_v26 = vpop.f32.mrb[20].mxu0 }
 0x6cc   :  { %2079 = vst.msk [vmem:[%s3077_s11 + $0x12] sm:$0x2] %vm2040_vm2, %v2015_v26  ;;  %v2421_v21 = vpop.f32.mrb[21].mxu0  ;;  %v2061_v27 = vrot.slane %v2015_v26, 1 }
 0x6ce   :  { %2062 = vrot.lane.b32.xlu0 %v2061_v27, %s2534_s18 }
 0x6cf   :  { %v2020_v28 = vpop.f32.mrb[22].mxu0 }
 0x6d0   :  { %v2424_v29 = vpop.f32.mrb[23].mxu0  ;;  %v2099_v30 = vrot.slane %v2020_v28, 1 }
 0x6d2   :  { %2026 = vrot.lane.b32.xlu0 %v2010_v23, %s2533_s14  ;;  %2100 = vrot.lane.b32.xlu1 %v2099_v30, %s2534_s18 }
 0x6d6   :  { %2075 = vrot.lane.b32.xlu0 %v2015_v26, %s2535_s0  ;;  %2071 = vrot.lane.b32.xlu1 %v2015_v26, %s2533_s14 }
 0x6da   :  { %2109 = vrot.lane.b32.xlu1 %v2020_v28, %s2533_s14 }
 0x73c   :  { %v2032_v31 = vpop.permute.xlu1 %2031 }
 0x73d   :  { %v2034_v32 = vadd.f32 %v2032_v31, %v2010_v23 }
 0x73f   :  { %2036 = vrot.lane.b32.xlu1 %v2034_v32, %s2535_s0 }
 0x740   :  { %v2063_v33 = vpop.permute.xlu0 %2062 }
 0x741   :  { %v2065_v34 = vadd.f32 %v2063_v33, %v2010_v23  ;;  %v2081_v35 = vadd.f32 %v2063_v33, %v2015_v26 }
 0x743   :  { %2067 = vrot.lane.b32.xlu0 %v2065_v34, %s2535_s0  ;;  %2083 = vrot.lane.b32.xlu1 %v2081_v35, %s2535_s0 }
 0x744   :  { %v2027_v36 = vpop.permute.xlu0 %2026  ;;  %v2101_v37 = vpop.permute.xlu1 %2100 }
 0x745   :  { %2029 = vst.msk [vmem:[%s3077_s11 + $0x1] sm:$0x1] %vm1385_vm9, %v2027_v36  ;;  %v2103_v38 = vadd.f32 %v2101_v37, %v2015_v26  ;;  %v2113_v41 = vadd.f32 %v2101_v37, %v2020_v28 }
 0x746   :  { %2041 = vst.msk [vmem:[%s3077_s11 + $0x2] sm:$0x2] %vm2040_vm2, %v2027_v36 }
 0x747   :  { %2044 = vst.msk [vmem:[%s3077_s11 + $0x3] sm:$0x4] %vm2043_vm1, %v2027_v36  ;;  %2120 = vrot.lane.b32.xlu1 %v2020_v28, %s2535_s0  ;;  %2105 = vrot.lane.b32.xlu0 %v2103_v38, %s2535_s0 }
 0x748   :  { %2047 = vst.msk [vmem:[%s3077_s11 + $0x4] sm:$0x8] %vm2046_vm3, %v2027_v36  ;;  %v2076_v39 = vpop.permute.xlu0 %2075  ;;  %v2072_v40 = vpop.permute.xlu1 %2071 }
 0x749   :  { %2050 = vst.msk [vmem:[%s3077_s11 + $0x5] sm:$0x10] %vm2049_vm7, %v2027_v36  ;;  %2091 = vst.msk [vmem:[%s3077_s11 + $0x16] sm:$0x10] %vm2049_vm7, %v2072_v40 }
 0x74a   :  { %2053 = vst.msk [vmem:[%s3077_s11 + $0x6] sm:$0x20] %vm2052_vm8, %v2027_v36  ;;  %2093 = vst.msk [vmem:[%s3077_s11 + $0x17] sm:$0x20] %vm2052_vm8, %v2072_v40 }
 0x74b   :  { %2056 = vst.msk [vmem:[%s3077_s11 + $0x7] sm:$0x40] %vm2055_vm10, %v2027_v36  ;;  %2095 = vst.msk [vmem:[%s3077_s11 + $0x18] sm:$0x40] %vm2055_vm10, %v2072_v40  ;;  %2115 = vrot.lane.b32.xlu0 %v2113_v41, %s2535_s0 }
 0x74c   :  { %2059 = vst.msk [vmem:[%s3077_s11 + $0x8] sm:$0x80] %vm2058_vm11, %v2027_v36  ;;  %2097 = vst.msk [vmem:[%s3077_s11 + $0x19] sm:$0x80] %vm2058_vm11, %v2072_v40  ;;  %v2110_v42 = vpop.permute.xlu1 %2109 }
 0x74d   :  { %2078 = vst.msk [vmem:[%s3077_s11 + $0x12] sm:$0x1] %vm1385_vm9, %v2076_v39  ;;  %2074 = vst.msk [vmem:[%s3077_s11 + $0x11] sm:$0x1] %vm1385_vm9, %v2072_v40 }
 0x74e   :  { %2080 = vst.msk [vmem:[%s3077_s11 + $0x13] sm:$0x2] %vm2040_vm2, %v2072_v40  ;;  %2119 = vst.msk [vmem:[%s3077_s11 + $0x23] sm:$0x2] %vm2040_vm2, %v2110_v42 }
 0x74f   :  { %2087 = vst.msk [vmem:[%s3077_s11 + $0x14] sm:$0x4] %vm2043_vm1, %v2072_v40 }
 0x750   :  { %2089 = vst.msk [vmem:[%s3077_s11 + $0x15] sm:$0x8] %vm2046_vm3, %v2072_v40 }
 0x751   :  { %2112 = vst.msk [vmem:[%s3077_s11 + $0x22] sm:$0x1] %vm1385_vm9, %v2110_v42 }
 0x7b1   :  { %v2037_v43 = vpop.permute.xlu1 %2036 }
 0x7b2   :  { %2039 = vst.msk [vmem:[%s3077_s11 + $0x2] sm:$0x1] %vm1385_vm9, %v2037_v43 }
 0x7b3   :  { %2042 = vst.msk [vmem:[%s3077_s11 + $0x3] sm:$0x2] %vm2040_vm2, %v2037_v43 }
 0x7b4   :  { %2045 = vst.msk [vmem:[%s3077_s11 + $0x4] sm:$0x4] %vm2043_vm1, %v2037_v43 }
 0x7b5   :  { %2048 = vst.msk [vmem:[%s3077_s11 + $0x5] sm:$0x8] %vm2046_vm3, %v2037_v43  ;;  %v2068_v44 = vpop.permute.xlu0 %2067  ;;  %v2084_v45 = vpop.permute.xlu1 %2083 }
 0x7b6   :  { %2051 = vst.msk [vmem:[%s3077_s11 + $0x6] sm:$0x10] %vm2049_vm7, %v2037_v43  ;;  %2092 = vst.msk [vmem:[%s3077_s11 + $0x17] sm:$0x10] %vm2049_vm7, %v2084_v45 }
 0x7b7   :  { %2054 = vst.msk [vmem:[%s3077_s11 + $0x7] sm:$0x20] %vm2052_vm8, %v2037_v43  ;;  %2094 = vst.msk [vmem:[%s3077_s11 + $0x18] sm:$0x20] %vm2052_vm8, %v2084_v45 }
 0x7b8   :  { %2057 = vst.msk [vmem:[%s3077_s11 + $0x8] sm:$0x40] %vm2055_vm10, %v2037_v43  ;;  %2096 = vst.msk [vmem:[%s3077_s11 + $0x19] sm:$0x40] %vm2055_vm10, %v2084_v45 }
 0x7b9   :  { %2070 = vst.msk [vmem:[%s3077_s11 + $0x9] sm:$0x80] %vm2058_vm11, %v2068_v44  ;;  %v2106_v49 = vpop.permute.xlu0 %2105  ;;  %v2121_v51 = vpop.permute.xlu1 %2120 }
 0x7ba   :  { %2086 = vst.msk [vmem:[%s3077_s11 + $0x14] sm:$0x2] %vm2040_vm2, %v2084_v45  ;;  %2123 = vst.msk [vmem:[%s3077_s11 + $0x24] sm:$0x2] %vm2040_vm2, %v2121_v51 }
 0x7bb   :  { %2088 = vst.msk [vmem:[%s3077_s11 + $0x15] sm:$0x4] %vm2043_vm1, %v2084_v45  ;;  %v2124_v47 = vld [vmem:[%s3077_s11] sm:$0xff] }
 0x7bc   :  { %2090 = vst.msk [vmem:[%s3077_s11 + $0x16] sm:$0x8] %vm2046_vm3, %v2084_v45  ;;  %v2131_v52 = vadd.f32 %v2130_v46, %v2124_v47 }
 0x7bd   :  { %2108 = vst.msk [vmem:[%s3077_s11 + $0x1a] sm:$0x80] %vm2058_vm11, %v2106_v49  ;;  %v2116_v56 = vpop.permute.xlu0 %2115 }
 0x7be   :  { %2136 = vst.msk [vmem:[%s3077_s11] sm:$0xff] %vm63_vm0, %v2131_v52 }
 0x7bf   :  { %v2125_v48 = vld [vmem:[%s3077_s11 + $0x8] sm:$0xff]  ;;  %2118 = vst.msk [vmem:[%s3077_s11 + $0x23] sm:$0x1] %vm1385_vm9, %v2116_v56 }
 0x7c0   :  { %v2132_v53 = vadd.f32 %v2130_v46, %v2125_v48 }
 0x7c2   :  { %2137 = vst.msk [vmem:[%s3077_s11 + $0x8] sm:$0xff] %vm63_vm0, %v2132_v53  ;;  %v2126_v54 = vld [vmem:[%s3077_s11 + $0x10] sm:$0xff] }
 0x7c3   :  { %v2127_v55 = vld [vmem:[%s3077_s11 + $0x18] sm:$0xff]  ;;  %v2133_v57 = vadd.f32 %v2130_v46, %v2126_v54 }
 0x7c4   :  { %v2134_v58 = vadd.f32 %v2130_v46, %v2127_v55 }
 0x7c5   :  { %2138 = vst.msk [vmem:[%s3077_s11 + $0x10] sm:$0xff] %vm63_vm0, %v2133_v57 }
 0x7c6   :  { %2139 = vst.msk [vmem:[%s3077_s11 + $0x18] sm:$0xff] %vm63_vm0, %v2134_v58  ;;  %v2128_v59 = vld [vmem:[%s3077_s11 + $0x20] sm:$0x3f] }
 0x7c7   :  { %v2135_v60 = vadd.f32 %v2130_v46, %v2128_v59 }
 0x7c9   :  { %2141 = vst.msk [vmem:[%s3077_s11 + $0x20] sm:$0x3f] %vm2140_vm12, %v2135_v60 }
 0x7ca   :  { %2146 = vsyncpa [#allocation8], 1 }

</bundles_post_ra>
